<compile_context>
chip_gen: v7x
topology: tpu7x:2x2x1
jax: 0.10.0
libtpu: 0.0.40
codegen_flags: <defaults>
</compile_context>

<pallas_src>
import functools
import math

import jax
import jax.numpy as jnp
from jax.experimental import pallas as pl
from jax.experimental.pallas import tpu as pltpu

sigma_hs = [5, 10, 20, 40]
LN_EPS = 1e-5  # PyTorch nn.LayerNorm default


# ----------------------------- Pallas kernel --------------------------------

def _layernorm(y, gamma, beta):
    mu = jnp.mean(y, axis=-1, keepdims=True)
    var = jnp.mean((y - mu) ** 2, axis=-1, keepdims=True)
    return (y - mu) * jax.lax.rsqrt(var + LN_EPS) * gamma + beta


def _encoder_fused_kernel(n_layers, n_heads, d_k, d_v, sigma, B, S,
                          xpe_ref, prew_ref, wqkv_ref, wo_ref, w1_ref,
                          w2_ref, ln_ref, o_ref):
    """Fused prelayer + n_layers encoder layers, whole batch in one call.

    xpe_ref : (B*S, F)   raw_input + positional encoding (batch folded)
    prew_ref: (F, F)     prelayer weight, pre-transposed to [in, out]
    wqkv_ref: (L, F, H*(2*d_k+d_v))  fused QKV weights, pre-transposed
    wo_ref  : (L, H*d_v, F)          output projection, pre-transposed
    w1_ref  : (L, F, d_ff)  w2_ref: (L, d_ff, F)   FFN, pre-transposed
    ln_ref  : (L, 4, F)   rows = [gamma1, beta1, gamma2, beta2]
    o_ref   : (B*S, F)
    """
    scale = 1.0 / math.sqrt(d_k)

    # --- prelayer: tanh((x + pe) @ Wpre^T) ---------------------------------
    enc = jnp.tanh(jnp.dot(xpe_ref[...], prew_ref[...],
                           preferred_element_type=jnp.float32))   # [B*S, F]

    # --- additive attention-mask bias, generated in-kernel -----------------
    # counter is never incremented in the reference, so every layer (and
    # every batch element) uses the same sigma_hs[0] window + causal mask.
    row = jax.lax.broadcasted_iota(jnp.int32, (S, S), 0)
    col = jax.lax.broadcasted_iota(jnp.int32, (S, S), 1)
    allowed = (col <= row) & ((row - col) < sigma)
    bias = jnp.where(allowed, 0.0, -1e9).astype(jnp.float32)      # [S, S]

    hk = n_heads * d_k

    for li in range(n_layers):            # static unroll, n_layers is small
        x = enc                                                    # [B*S, F]

        # ---- multi-head self attention (fused QKV projection) ----
        qkv = jnp.dot(x, wqkv_ref[li],
                      preferred_element_type=jnp.float32)   # [B*S, H*(2dk+dv)]
        q_all = qkv[:, :hk]
        k_all = qkv[:, hk:2 * hk]
        v_all = qkv[:, 2 * hk:]

        ctx_heads = []
        for h in range(n_heads):          # static unroll, H is small
            q = q_all[:, h * d_k:(h + 1) * d_k].reshape(B, S, d_k)
            k = k_all[:, h * d_k:(h + 1) * d_k].reshape(B, S, d_k)
            v = v_all[:, h * d_v:(h + 1) * d_v].reshape(B, S, d_v)
            s = jnp.einsum("bqd,bkd->bqk", q, k,
                           preferred_element_type=jnp.float32) * scale
            s = s + bias[None, :, :]
            # explicit softmax: max-subtract + exp + reciprocal-multiply
            m = jnp.max(s, axis=-1, keepdims=True)
            p = jnp.exp(s - m)
            l = jnp.sum(p, axis=-1, keepdims=True)
            # NOTE: approx=True would route the reciprocal to the EUP slot;
            # kept exact to stay safely within tolerance vs the f32 reference.
            p = p * pl.reciprocal(l, approx=False)
            ctx = jnp.einsum("bqk,bkd->bqd", p, v,
                             preferred_element_type=jnp.float32)  # [B,S,dv]
            ctx_heads.append(ctx.reshape(B * S, d_v))

        ctx_cat = jnp.concatenate(ctx_heads, axis=-1)              # [B*S,H*dv]
        attn_out = jnp.dot(ctx_cat, wo_ref[li],
                           preferred_element_type=jnp.float32)     # [B*S, F]

        ln = ln_ref[li]                                            # [4, F]
        y1 = _layernorm(attn_out + x, ln[0:1, :], ln[1:2, :])

        # ---- position-wise feed forward ----
        hid = jnp.maximum(
            jnp.dot(y1, w1_ref[li], preferred_element_type=jnp.float32), 0.0)
        ffn = jnp.dot(hid, w2_ref[li], preferred_element_type=jnp.float32)
        enc = _layernorm(ffn + y1, ln[2:3, :], ln[3:4, :])

    o_ref[...] = enc


# ------------------------------ Wrapper --------------------------------------

def positional_encoding(S, F):
    pos = jnp.arange(S, dtype=jnp.float32)[:, None]
    i = jnp.arange(0, F, 2, dtype=jnp.float32)
    div = jnp.exp(-jnp.log(10000.0) * i / F)
    pe = jnp.zeros((S, F), jnp.float32)
    pe = pe.at[:, 0::2].set(jnp.sin(pos * div))
    pe = pe.at[:, 1::2].set(jnp.cos(pos * div))
    return pe


def encoder_forward(raw_input, params, n_layers, n_heads, d_k, d_v):
    B, S, F = raw_input.shape
    pe = positional_encoding(S, F)

    # Host-side layout plumbing (free one-time XLA ops): fold batch into rows,
    # add positional encoding, pre-transpose / fuse / stack all weights.
    xpe = (raw_input.astype(jnp.float32) + pe[None]).reshape(B * S, F)
    prew_t = params["pre_w"].T                                     # [F, F]

    layers = params["layers"]
    wqkv = jnp.stack([jnp.concatenate([p["wq"], p["wk"], p["wv"]], axis=0).T
                      for p in layers])         # [L, F, H*(2dk+dv)]
    wo = jnp.stack([p["wo"].T for p in layers])                    # [L,H*dv,F]
    w1 = jnp.stack([p["w1"].T for p in layers])                    # [L,F,d_ff]
    w2 = jnp.stack([p["w2"].T for p in layers])                    # [L,d_ff,F]
    ln = jnp.stack([jnp.concatenate([p["g1"], p["b1"], p["g2"], p["b2"]],
                                    axis=0) for p in layers])      # [L, 4, F]

    kernel = functools.partial(_encoder_fused_kernel, n_layers, n_heads,
                               d_k, d_v, sigma_hs[0], B, S)
    out = pl.pallas_call(
        kernel,
        out_shape=jax.ShapeDtypeStruct((B * S, F), jnp.float32),
        compiler_params=pltpu.CompilerParams(
            vmem_limit_bytes=32 * 1024 * 1024),
    )(xpe, prew_t, wqkv, wo, w1, w2, ln)

    w_vhs = [p["wv"] for p in layers]   # mirrors self.w_vhs (W_V.weight)
    return out.reshape(B, S, F), w_vhs


# ----------------------- Deterministic parameter init -----------------------

def init_params(key, f_size, d_q, d_k, d_v, n_heads, d_ff, n_layers):
    del d_q  # nn.Linear projections use d_k / d_v (d_q unused, as in ref)
    keys = jax.random.split(key, 1 + 6 * n_layers)
    s = 0.1
    params = {"pre_w": s * jax.random.normal(keys[0], (f_size, f_size),
                                             jnp.float32)}
    layers = []
    ki = 1
    for _ in range(n_layers):
        layers.append(dict(
            wq=s * jax.random.normal(keys[ki + 0], (n_heads * d_k, f_size)),
            wk=s * jax.random.normal(keys[ki + 1], (n_heads * d_k, f_size)),
            wv=s * jax.random.normal(keys[ki + 2], (n_heads * d_v, f_size)),
            wo=s * jax.random.normal(keys[ki + 3], (f_size, n_heads * d_v)),
            w1=s * jax.random.normal(keys[ki + 4], (d_ff, f_size)),
            w2=s * jax.random.normal(keys[ki + 5], (f_size, d_ff)),
            g1=jnp.ones((1, f_size), jnp.float32),
            b1=jnp.zeros((1, f_size), jnp.float32),
            g2=jnp.ones((1, f_size), jnp.float32),
            b2=jnp.zeros((1, f_size), jnp.float32)))
        ki += 6
    params["layers"] = layers
    return params


# ----------------------------- Pure-JAX reference ---------------------------

def get_attn_subsequence_mask(B, S):
    # 1 = allowed (self + past), 0 = blocked (future)
    allowed = jnp.tril(jnp.ones((S, S), jnp.float32))
    return jnp.broadcast_to(allowed, (B, S, S))


def get_hierarchical_mask(B, S, sigma_h):
    i = jnp.arange(S)[:, None]
    j = jnp.arange(S)[None, :]
    allowed = (jnp.abs(i - j) < sigma_h).astype(jnp.float32)
    return jnp.broadcast_to(allowed, (B, S, S))


def encoder_reference(x, params, n_layers, n_heads, d_k, d_v):
    B, S, F = x.shape
    hp = jax.lax.Precision.HIGHEST
    pe = positional_encoding(S, F)
    enc = jnp.tanh(jnp.einsum("bsf,of->bso", x + pe, params["pre_w"],
                              precision=hp))
    seq_mask = get_attn_subsequence_mask(B, S)
    for li in range(n_layers):
        p = params["layers"][li]
        # counter never increments in the reference module -> sigma_hs[0]
        mask = get_hierarchical_mask(B, S, sigma_hs[0]) * seq_mask
        def proj(w, d):
            return jnp.einsum("bsf,of->bso", enc, w, precision=hp).reshape(
                B, S, n_heads, d).transpose(0, 2, 1, 3)
        q, k, v = proj(p["wq"], d_k), proj(p["wk"], d_k), proj(p["wv"], d_v)
        sc = jnp.einsum("bhqd,bhkd->bhqk", q, k, precision=hp) / math.sqrt(d_k)
        sc = jnp.where(mask[:, None] == 0, -1e9, sc)
        attn = jax.nn.softmax(sc, axis=-1)
        ctx = jnp.einsum("bhqk,bhkd->bhqd", attn, v,
                         precision=hp).transpose(0, 2, 1, 3).reshape(
                             B, S, n_heads * d_v)
        o = jnp.einsum("bsd,fd->bsf", ctx, p["wo"], precision=hp)
        y1 = _layernorm(o + enc, p["g1"][0], p["b1"][0])
        h = jnp.maximum(jnp.einsum("bsf,df->bsd", y1, p["w1"], precision=hp),
                        0.0)
        ffn = jnp.einsum("bsd,fd->bsf", h, p["w2"], precision=hp)
        enc = _layernorm(ffn + y1, p["g2"][0], p["b2"][0])
    return enc


# --------------------------------- Main --------------------------------------

if __name__ == "__main__":
    B, S, F = 2, 8, 32          # batch, seq_len, f_size
    d_q = d_k = d_v = 16
    n_heads, d_ff, n_layers = 2, 64, 2

    key = jax.random.PRNGKey(0)
    kp, kx = jax.random.split(key)
    params = init_params(kp, F, d_q, d_k, d_v, n_heads, d_ff, n_layers)
    raw_input = jax.random.normal(kx, (B, S, F), jnp.float32)

    out, w_vhs = encoder_forward(raw_input, params, n_layers, n_heads, d_k, d_v)
    out = jax.block_until_ready(out)

    ref = encoder_reference(raw_input, params, n_layers, n_heads, d_k, d_v)
    assert out.shape == (B, S, F)
    assert len(w_vhs) == n_layers
    assert bool(jnp.all(jnp.isfinite(out)))
    assert bool(jnp.allclose(out, ref, atol=1e-3, rtol=1e-3))
    print("KERNEL_OK")
</pallas_src>

<mosaic_0001>
module attributes {stable_mosaic.version = 11 : i64} {
  func.func @_encoder_fused_kernel(%arg0: memref<16x32xf32, #tpu.memory_space<vmem>>, %arg1: memref<32x32xf32, #tpu.memory_space<vmem>>, %arg2: memref<2x32x96xf32, #tpu.memory_space<vmem>>, %arg3: memref<2x32x32xf32, #tpu.memory_space<vmem>>, %arg4: memref<2x32x64xf32, #tpu.memory_space<vmem>>, %arg5: memref<2x64x32xf32, #tpu.memory_space<vmem>>, %arg6: memref<2x4x32xf32, #tpu.memory_space<vmem>>, %arg7: memref<16x32xf32, #tpu.memory_space<vmem>>) attributes {dimension_semantics = [], scalar_prefetch = 0 : i64, scratch_operands = 0 : i64, tpu.core_type = #tpu.core_type<tc>} {
    %c0 = arith.constant 0 : index
    %c0_0 = arith.constant 0 : index
    %0 = vector.load %arg0[%c0, %c0_0] : memref<16x32xf32, #tpu.memory_space<vmem>>, vector<16x32xf32>
    %c0_1 = arith.constant 0 : index
    %c0_2 = arith.constant 0 : index
    %1 = vector.load %arg1[%c0_1, %c0_2] : memref<32x32xf32, #tpu.memory_space<vmem>>, vector<32x32xf32>
    %cst = arith.constant dense<0.000000e+00> : vector<16x32xf32>
    %2 = tpu.matmul %0, %1, %cst {dimension_numbers = #tpu.dot_dimension_numbers<[1], [0], [0], [1], [0, 0, 1, 1], [], []>} : vector<16x32xf32>, vector<32x32xf32>, vector<16x32xf32> -> vector<16x32xf32>
    %3 = math.tanh %2 : vector<16x32xf32>
    %4 = tpu.iota {dimensions = array<i32: 0>} : vector<8x8xi32>
    %5 = tpu.iota {dimensions = array<i32: 1>} : vector<8x8xi32>
    %6 = arith.cmpi sle, %5, %4 : vector<8x8xi32>
    %7 = arith.subi %4, %5 : vector<8x8xi32>
    %c5_i32 = arith.constant 5 : i32
    %8 = vector.broadcast %c5_i32 : i32 to vector<8x8xi32>
    %9 = arith.cmpi slt, %7, %8 : vector<8x8xi32>
    %10 = arith.andi %6, %9 : vector<8x8xi1>
    %cst_3 = arith.constant 0.000000e+00 : f32
    %cst_4 = arith.constant -1.000000e+09 : f32
    %11 = vector.broadcast %cst_3 : f32 to vector<8x8xf32>
    %12 = vector.broadcast %cst_4 : f32 to vector<8x8xf32>
    %13 = arith.select %10, %11, %12 : vector<8x8xi1>, vector<8x8xf32>
    %c0_5 = arith.constant 0 : index
    %c0_6 = arith.constant 0 : index
    %c0_7 = arith.constant 0 : index
    %14 = vector.load %arg2[%c0_5, %c0_6, %c0_7] : memref<2x32x96xf32, #tpu.memory_space<vmem>>, vector<1x32x96xf32>
    %15 = vector.shape_cast %14 : vector<1x32x96xf32> to vector<32x96xf32>
    %cst_8 = arith.constant dense<0.000000e+00> : vector<16x96xf32>
    %16 = tpu.matmul %3, %15, %cst_8 {dimension_numbers = #tpu.dot_dimension_numbers<[1], [0], [0], [1], [0, 0, 1, 1], [], []>} : vector<16x32xf32>, vector<32x96xf32>, vector<16x96xf32> -> vector<16x96xf32>
    %17 = vector.extract_strided_slice %16 {offsets = [0, 0], sizes = [16, 32], strides = [1, 1]} : vector<16x96xf32> to vector<16x32xf32>
    %18 = vector.extract_strided_slice %16 {offsets = [0, 32], sizes = [16, 32], strides = [1, 1]} : vector<16x96xf32> to vector<16x32xf32>
    %19 = vector.extract_strided_slice %16 {offsets = [0, 64], sizes = [16, 32], strides = [1, 1]} : vector<16x96xf32> to vector<16x32xf32>
    %20 = vector.extract_strided_slice %17 {offsets = [0, 0], sizes = [16, 16], strides = [1, 1]} : vector<16x32xf32> to vector<16x16xf32>
    %21 = vector.shape_cast %20 : vector<16x16xf32> to vector<2x8x16xf32>
    %22 = vector.extract_strided_slice %18 {offsets = [0, 0], sizes = [16, 16], strides = [1, 1]} : vector<16x32xf32> to vector<16x16xf32>
    %23 = vector.shape_cast %22 : vector<16x16xf32> to vector<2x8x16xf32>
    %24 = vector.extract_strided_slice %19 {offsets = [0, 0], sizes = [16, 16], strides = [1, 1]} : vector<16x32xf32> to vector<16x16xf32>
    %25 = vector.shape_cast %24 : vector<16x16xf32> to vector<2x8x16xf32>
    "tpu.trace_start"() <{level = 10 : i32, message = "bqd,bkd->bqk"}> : () -> ()
    %cst_9 = arith.constant dense<0.000000e+00> : vector<2x8x8xf32>
    %26 = tpu.matmul %21, %23, %cst_9 {dimension_numbers = #tpu.dot_dimension_numbers<[2], [2], [1], [1], [0, 0, 0, 1, 1, 1], [0], [0]>} : vector<2x8x16xf32>, vector<2x8x16xf32>, vector<2x8x8xf32> -> vector<2x8x8xf32>
    "tpu.trace_stop"() : () -> ()
    %cst_10 = arith.constant 2.500000e-01 : f32
    %27 = vector.broadcast %cst_10 : f32 to vector<2x8x8xf32>
    %28 = arith.mulf %26, %27 : vector<2x8x8xf32>
    %29 = vector.shape_cast %13 : vector<8x8xf32> to vector<1x8x8xf32>
    %30 = vector.broadcast %29 : vector<1x8x8xf32> to vector<2x8x8xf32>
    %31 = arith.addf %28, %30 : vector<2x8x8xf32>
    %cst_11 = arith.constant dense<0xFF800000> : vector<2x8xf32>
    %32 = vector.multi_reduction <maximumf>, %31, %cst_11 [2] : vector<2x8x8xf32> to vector<2x8xf32>
    %33 = vector.shape_cast %32 : vector<2x8xf32> to vector<2x8x1xf32>
    %34 = vector.broadcast %33 : vector<2x8x1xf32> to vector<2x8x8xf32>
    %35 = arith.subf %31, %34 : vector<2x8x8xf32>
    %36 = math.exp %35 : vector<2x8x8xf32>
    %cst_12 = arith.constant dense<0.000000e+00> : vector<2x8xf32>
    %37 = vector.multi_reduction <add>, %36, %cst_12 [2] : vector<2x8x8xf32> to vector<2x8xf32>
    %38 = vector.shape_cast %37 : vector<2x8xf32> to vector<2x8x1xf32>
    %39 = tpu.reciprocal %38 : vector<2x8x1xf32> -> vector<2x8x1xf32>
    %40 = vector.broadcast %39 : vector<2x8x1xf32> to vector<2x8x8xf32>
    %41 = arith.mulf %36, %40 : vector<2x8x8xf32>
    "tpu.trace_start"() <{level = 10 : i32, message = "bqk,bkd->bqd"}> : () -> ()
    %cst_13 = arith.constant dense<0.000000e+00> : vector<2x8x16xf32>
    %42 = tpu.matmul %41, %25, %cst_13 {dimension_numbers = #tpu.dot_dimension_numbers<[2], [1], [1], [2], [0, 0, 0, 1, 1, 2], [0], [0]>} : vector<2x8x8xf32>, vector<2x8x16xf32>, vector<2x8x16xf32> -> vector<2x8x16xf32>
    "tpu.trace_stop"() : () -> ()
    %43 = vector.shape_cast %42 : vector<2x8x16xf32> to vector<16x16xf32>
    %44 = vector.extract_strided_slice %17 {offsets = [0, 16], sizes = [16, 16], strides = [1, 1]} : vector<16x32xf32> to vector<16x16xf32>
    %45 = vector.shape_cast %44 : vector<16x16xf32> to vector<2x8x16xf32>
    %46 = vector.extract_strided_slice %18 {offsets = [0, 16], sizes = [16, 16], strides = [1, 1]} : vector<16x32xf32> to vector<16x16xf32>
    %47 = vector.shape_cast %46 : vector<16x16xf32> to vector<2x8x16xf32>
    %48 = vector.extract_strided_slice %19 {offsets = [0, 16], sizes = [16, 16], strides = [1, 1]} : vector<16x32xf32> to vector<16x16xf32>
    %49 = vector.shape_cast %48 : vector<16x16xf32> to vector<2x8x16xf32>
    "tpu.trace_start"() <{level = 10 : i32, message = "bqd,bkd->bqk"}> : () -> ()
    %cst_14 = arith.constant dense<0.000000e+00> : vector<2x8x8xf32>
    %50 = tpu.matmul %45, %47, %cst_14 {dimension_numbers = #tpu.dot_dimension_numbers<[2], [2], [1], [1], [0, 0, 0, 1, 1, 1], [0], [0]>} : vector<2x8x16xf32>, vector<2x8x16xf32>, vector<2x8x8xf32> -> vector<2x8x8xf32>
    "tpu.trace_stop"() : () -> ()
    %cst_15 = arith.constant 2.500000e-01 : f32
    %51 = vector.broadcast %cst_15 : f32 to vector<2x8x8xf32>
    %52 = arith.mulf %50, %51 : vector<2x8x8xf32>
    %53 = vector.shape_cast %13 : vector<8x8xf32> to vector<1x8x8xf32>
    %54 = vector.broadcast %53 : vector<1x8x8xf32> to vector<2x8x8xf32>
    %55 = arith.addf %52, %54 : vector<2x8x8xf32>
    %cst_16 = arith.constant dense<0xFF800000> : vector<2x8xf32>
    %56 = vector.multi_reduction <maximumf>, %55, %cst_16 [2] : vector<2x8x8xf32> to vector<2x8xf32>
    %57 = vector.shape_cast %56 : vector<2x8xf32> to vector<2x8x1xf32>
    %58 = vector.broadcast %57 : vector<2x8x1xf32> to vector<2x8x8xf32>
    %59 = arith.subf %55, %58 : vector<2x8x8xf32>
    %60 = math.exp %59 : vector<2x8x8xf32>
    %cst_17 = arith.constant dense<0.000000e+00> : vector<2x8xf32>
    %61 = vector.multi_reduction <add>, %60, %cst_17 [2] : vector<2x8x8xf32> to vector<2x8xf32>
    %62 = vector.shape_cast %61 : vector<2x8xf32> to vector<2x8x1xf32>
    %63 = tpu.reciprocal %62 : vector<2x8x1xf32> -> vector<2x8x1xf32>
    %64 = vector.broadcast %63 : vector<2x8x1xf32> to vector<2x8x8xf32>
    %65 = arith.mulf %60, %64 : vector<2x8x8xf32>
    "tpu.trace_start"() <{level = 10 : i32, message = "bqk,bkd->bqd"}> : () -> ()
    %cst_18 = arith.constant dense<0.000000e+00> : vector<2x8x16xf32>
    %66 = tpu.matmul %65, %49, %cst_18 {dimension_numbers = #tpu.dot_dimension_numbers<[2], [1], [1], [2], [0, 0, 0, 1, 1, 2], [0], [0]>} : vector<2x8x8xf32>, vector<2x8x16xf32>, vector<2x8x16xf32> -> vector<2x8x16xf32>
    "tpu.trace_stop"() : () -> ()
    %67 = vector.shape_cast %66 : vector<2x8x16xf32> to vector<16x16xf32>
    %68 = tpu.concatenate %43, %67 in 1 : vector<16x16xf32>, vector<16x16xf32> -> vector<16x32xf32>
    %c0_19 = arith.constant 0 : index
    %c0_20 = arith.constant 0 : index
    %c0_21 = arith.constant 0 : index
    %69 = vector.load %arg3[%c0_19, %c0_20, %c0_21] : memref<2x32x32xf32, #tpu.memory_space<vmem>>, vector<1x32x32xf32>
    %70 = vector.shape_cast %69 : vector<1x32x32xf32> to vector<32x32xf32>
    %cst_22 = arith.constant dense<0.000000e+00> : vector<16x32xf32>
    %71 = tpu.matmul %68, %70, %cst_22 {dimension_numbers = #tpu.dot_dimension_numbers<[1], [0], [0], [1], [0, 0, 1, 1], [], []>} : vector<16x32xf32>, vector<32x32xf32>, vector<16x32xf32> -> vector<16x32xf32>
    %c0_23 = arith.constant 0 : index
    %c0_24 = arith.constant 0 : index
    %c0_25 = arith.constant 0 : index
    %72 = vector.load %arg6[%c0_23, %c0_24, %c0_25] : memref<2x4x32xf32, #tpu.memory_space<vmem>>, vector<1x4x32xf32>
    %73 = vector.shape_cast %72 : vector<1x4x32xf32> to vector<4x32xf32>
    %74 = arith.addf %71, %3 : vector<16x32xf32>
    %75 = vector.extract_strided_slice %73 {offsets = [0, 0], sizes = [1, 32], strides = [1, 1]} : vector<4x32xf32> to vector<1x32xf32>
    %76 = vector.extract_strided_slice %73 {offsets = [1, 0], sizes = [1, 32], strides = [1, 1]} : vector<4x32xf32> to vector<1x32xf32>
    %cst_26 = arith.constant dense<0.000000e+00> : vector<16xf32>
    %77 = vector.multi_reduction <add>, %74, %cst_26 [1] : vector<16x32xf32> to vector<16xf32>
    %78 = vector.shape_cast %77 : vector<16xf32> to vector<16x1xf32>
    %cst_27 = arith.constant 3.200000e+01 : f32
    %79 = vector.broadcast %cst_27 : f32 to vector<16x1xf32>
    %80 = arith.divf %78, %79 : vector<16x1xf32>
    %81 = vector.broadcast %80 : vector<16x1xf32> to vector<16x32xf32>
    %82 = arith.subf %74, %81 : vector<16x32xf32>
    %83 = arith.mulf %82, %82 : vector<16x32xf32>
    %cst_28 = arith.constant dense<0.000000e+00> : vector<16xf32>
    %84 = vector.multi_reduction <add>, %83, %cst_28 [1] : vector<16x32xf32> to vector<16xf32>
    %85 = vector.shape_cast %84 : vector<16xf32> to vector<16x1xf32>
    %cst_29 = arith.constant 3.200000e+01 : f32
    %86 = vector.broadcast %cst_29 : f32 to vector<16x1xf32>
    %87 = arith.divf %85, %86 : vector<16x1xf32>
    %88 = vector.broadcast %80 : vector<16x1xf32> to vector<16x32xf32>
    %89 = arith.subf %74, %88 : vector<16x32xf32>
    %cst_30 = arith.constant 9.99999974E-6 : f32
    %90 = vector.broadcast %cst_30 : f32 to vector<16x1xf32>
    %91 = arith.addf %87, %90 : vector<16x1xf32>
    %92 = math.rsqrt %91 : vector<16x1xf32>
    %93 = vector.broadcast %92 : vector<16x1xf32> to vector<16x32xf32>
    %94 = arith.mulf %89, %93 : vector<16x32xf32>
    %95 = vector.broadcast %75 : vector<1x32xf32> to vector<16x32xf32>
    %96 = arith.mulf %94, %95 : vector<16x32xf32>
    %97 = vector.broadcast %76 : vector<1x32xf32> to vector<16x32xf32>
    %98 = arith.addf %96, %97 : vector<16x32xf32>
    %c0_31 = arith.constant 0 : index
    %c0_32 = arith.constant 0 : index
    %c0_33 = arith.constant 0 : index
    %99 = vector.load %arg4[%c0_31, %c0_32, %c0_33] : memref<2x32x64xf32, #tpu.memory_space<vmem>>, vector<1x32x64xf32>
    %100 = vector.shape_cast %99 : vector<1x32x64xf32> to vector<32x64xf32>
    %cst_34 = arith.constant dense<0.000000e+00> : vector<16x64xf32>
    %101 = tpu.matmul %98, %100, %cst_34 {dimension_numbers = #tpu.dot_dimension_numbers<[1], [0], [0], [1], [0, 0, 1, 1], [], []>} : vector<16x32xf32>, vector<32x64xf32>, vector<16x64xf32> -> vector<16x64xf32>
    %cst_35 = arith.constant 0.000000e+00 : f32
    %102 = vector.broadcast %cst_35 : f32 to vector<16x64xf32>
    %103 = arith.maximumf %101, %102 : vector<16x64xf32>
    %c0_36 = arith.constant 0 : index
    %c0_37 = arith.constant 0 : index
    %c0_38 = arith.constant 0 : index
    %104 = vector.load %arg5[%c0_36, %c0_37, %c0_38] : memref<2x64x32xf32, #tpu.memory_space<vmem>>, vector<1x64x32xf32>
    %105 = vector.shape_cast %104 : vector<1x64x32xf32> to vector<64x32xf32>
    %cst_39 = arith.constant dense<0.000000e+00> : vector<16x32xf32>
    %106 = tpu.matmul %103, %105, %cst_39 {dimension_numbers = #tpu.dot_dimension_numbers<[1], [0], [0], [1], [0, 0, 1, 1], [], []>} : vector<16x64xf32>, vector<64x32xf32>, vector<16x32xf32> -> vector<16x32xf32>
    %107 = arith.addf %106, %98 : vector<16x32xf32>
    %108 = vector.extract_strided_slice %73 {offsets = [2, 0], sizes = [1, 32], strides = [1, 1]} : vector<4x32xf32> to vector<1x32xf32>
    %109 = vector.extract_strided_slice %73 {offsets = [3, 0], sizes = [1, 32], strides = [1, 1]} : vector<4x32xf32> to vector<1x32xf32>
    %cst_40 = arith.constant dense<0.000000e+00> : vector<16xf32>
    %110 = vector.multi_reduction <add>, %107, %cst_40 [1] : vector<16x32xf32> to vector<16xf32>
    %111 = vector.shape_cast %110 : vector<16xf32> to vector<16x1xf32>
    %cst_41 = arith.constant 3.200000e+01 : f32
    %112 = vector.broadcast %cst_41 : f32 to vector<16x1xf32>
    %113 = arith.divf %111, %112 : vector<16x1xf32>
    %114 = vector.broadcast %113 : vector<16x1xf32> to vector<16x32xf32>
    %115 = arith.subf %107, %114 : vector<16x32xf32>
    %116 = arith.mulf %115, %115 : vector<16x32xf32>
    %cst_42 = arith.constant dense<0.000000e+00> : vector<16xf32>
    %117 = vector.multi_reduction <add>, %116, %cst_42 [1] : vector<16x32xf32> to vector<16xf32>
    %118 = vector.shape_cast %117 : vector<16xf32> to vector<16x1xf32>
    %cst_43 = arith.constant 3.200000e+01 : f32
    %119 = vector.broadcast %cst_43 : f32 to vector<16x1xf32>
    %120 = arith.divf %118, %119 : vector<16x1xf32>
    %121 = vector.broadcast %113 : vector<16x1xf32> to vector<16x32xf32>
    %122 = arith.subf %107, %121 : vector<16x32xf32>
    %cst_44 = arith.constant 9.99999974E-6 : f32
    %123 = vector.broadcast %cst_44 : f32 to vector<16x1xf32>
    %124 = arith.addf %120, %123 : vector<16x1xf32>
    %125 = math.rsqrt %124 : vector<16x1xf32>
    %126 = vector.broadcast %125 : vector<16x1xf32> to vector<16x32xf32>
    %127 = arith.mulf %122, %126 : vector<16x32xf32>
    %128 = vector.broadcast %108 : vector<1x32xf32> to vector<16x32xf32>
    %129 = arith.mulf %127, %128 : vector<16x32xf32>
    %130 = vector.broadcast %109 : vector<1x32xf32> to vector<16x32xf32>
    %131 = arith.addf %129, %130 : vector<16x32xf32>
    %c1 = arith.constant 1 : index
    %c0_45 = arith.constant 0 : index
    %c0_46 = arith.constant 0 : index
    %132 = vector.load %arg2[%c1, %c0_45, %c0_46] : memref<2x32x96xf32, #tpu.memory_space<vmem>>, vector<1x32x96xf32>
    %133 = vector.shape_cast %132 : vector<1x32x96xf32> to vector<32x96xf32>
    %cst_47 = arith.constant dense<0.000000e+00> : vector<16x96xf32>
    %134 = tpu.matmul %131, %133, %cst_47 {dimension_numbers = #tpu.dot_dimension_numbers<[1], [0], [0], [1], [0, 0, 1, 1], [], []>} : vector<16x32xf32>, vector<32x96xf32>, vector<16x96xf32> -> vector<16x96xf32>
    %135 = vector.extract_strided_slice %134 {offsets = [0, 0], sizes = [16, 32], strides = [1, 1]} : vector<16x96xf32> to vector<16x32xf32>
    %136 = vector.extract_strided_slice %134 {offsets = [0, 32], sizes = [16, 32], strides = [1, 1]} : vector<16x96xf32> to vector<16x32xf32>
    %137 = vector.extract_strided_slice %134 {offsets = [0, 64], sizes = [16, 32], strides = [1, 1]} : vector<16x96xf32> to vector<16x32xf32>
    %138 = vector.extract_strided_slice %135 {offsets = [0, 0], sizes = [16, 16], strides = [1, 1]} : vector<16x32xf32> to vector<16x16xf32>
    %139 = vector.shape_cast %138 : vector<16x16xf32> to vector<2x8x16xf32>
    %140 = vector.extract_strided_slice %136 {offsets = [0, 0], sizes = [16, 16], strides = [1, 1]} : vector<16x32xf32> to vector<16x16xf32>
    %141 = vector.shape_cast %140 : vector<16x16xf32> to vector<2x8x16xf32>
    %142 = vector.extract_strided_slice %137 {offsets = [0, 0], sizes = [16, 16], strides = [1, 1]} : vector<16x32xf32> to vector<16x16xf32>
    %143 = vector.shape_cast %142 : vector<16x16xf32> to vector<2x8x16xf32>
    "tpu.trace_start"() <{level = 10 : i32, message = "bqd,bkd->bqk"}> : () -> ()
    %cst_48 = arith.constant dense<0.000000e+00> : vector<2x8x8xf32>
    %144 = tpu.matmul %139, %141, %cst_48 {dimension_numbers = #tpu.dot_dimension_numbers<[2], [2], [1], [1], [0, 0, 0, 1, 1, 1], [0], [0]>} : vector<2x8x16xf32>, vector<2x8x16xf32>, vector<2x8x8xf32> -> vector<2x8x8xf32>
    "tpu.trace_stop"() : () -> ()
    %cst_49 = arith.constant 2.500000e-01 : f32
    %145 = vector.broadcast %cst_49 : f32 to vector<2x8x8xf32>
    %146 = arith.mulf %144, %145 : vector<2x8x8xf32>
    %147 = vector.shape_cast %13 : vector<8x8xf32> to vector<1x8x8xf32>
    %148 = vector.broadcast %147 : vector<1x8x8xf32> to vector<2x8x8xf32>
    %149 = arith.addf %146, %148 : vector<2x8x8xf32>
    %cst_50 = arith.constant dense<0xFF800000> : vector<2x8xf32>
    %150 = vector.multi_reduction <maximumf>, %149, %cst_50 [2] : vector<2x8x8xf32> to vector<2x8xf32>
    %151 = vector.shape_cast %150 : vector<2x8xf32> to vector<2x8x1xf32>
    %152 = vector.broadcast %151 : vector<2x8x1xf32> to vector<2x8x8xf32>
    %153 = arith.subf %149, %152 : vector<2x8x8xf32>
    %154 = math.exp %153 : vector<2x8x8xf32>
    %cst_51 = arith.constant dense<0.000000e+00> : vector<2x8xf32>
    %155 = vector.multi_reduction <add>, %154, %cst_51 [2] : vector<2x8x8xf32> to vector<2x8xf32>
    %156 = vector.shape_cast %155 : vector<2x8xf32> to vector<2x8x1xf32>
    %157 = tpu.reciprocal %156 : vector<2x8x1xf32> -> vector<2x8x1xf32>
    %158 = vector.broadcast %157 : vector<2x8x1xf32> to vector<2x8x8xf32>
    %159 = arith.mulf %154, %158 : vector<2x8x8xf32>
    "tpu.trace_start"() <{level = 10 : i32, message = "bqk,bkd->bqd"}> : () -> ()
    %cst_52 = arith.constant dense<0.000000e+00> : vector<2x8x16xf32>
    %160 = tpu.matmul %159, %143, %cst_52 {dimension_numbers = #tpu.dot_dimension_numbers<[2], [1], [1], [2], [0, 0, 0, 1, 1, 2], [0], [0]>} : vector<2x8x8xf32>, vector<2x8x16xf32>, vector<2x8x16xf32> -> vector<2x8x16xf32>
    "tpu.trace_stop"() : () -> ()
    %161 = vector.shape_cast %160 : vector<2x8x16xf32> to vector<16x16xf32>
    %162 = vector.extract_strided_slice %135 {offsets = [0, 16], sizes = [16, 16], strides = [1, 1]} : vector<16x32xf32> to vector<16x16xf32>
    %163 = vector.shape_cast %162 : vector<16x16xf32> to vector<2x8x16xf32>
    %164 = vector.extract_strided_slice %136 {offsets = [0, 16], sizes = [16, 16], strides = [1, 1]} : vector<16x32xf32> to vector<16x16xf32>
    %165 = vector.shape_cast %164 : vector<16x16xf32> to vector<2x8x16xf32>
    %166 = vector.extract_strided_slice %137 {offsets = [0, 16], sizes = [16, 16], strides = [1, 1]} : vector<16x32xf32> to vector<16x16xf32>
    %167 = vector.shape_cast %166 : vector<16x16xf32> to vector<2x8x16xf32>
    "tpu.trace_start"() <{level = 10 : i32, message = "bqd,bkd->bqk"}> : () -> ()
    %cst_53 = arith.constant dense<0.000000e+00> : vector<2x8x8xf32>
    %168 = tpu.matmul %163, %165, %cst_53 {dimension_numbers = #tpu.dot_dimension_numbers<[2], [2], [1], [1], [0, 0, 0, 1, 1, 1], [0], [0]>} : vector<2x8x16xf32>, vector<2x8x16xf32>, vector<2x8x8xf32> -> vector<2x8x8xf32>
    "tpu.trace_stop"() : () -> ()
    %cst_54 = arith.constant 2.500000e-01 : f32
    %169 = vector.broadcast %cst_54 : f32 to vector<2x8x8xf32>
    %170 = arith.mulf %168, %169 : vector<2x8x8xf32>
    %171 = vector.shape_cast %13 : vector<8x8xf32> to vector<1x8x8xf32>
    %172 = vector.broadcast %171 : vector<1x8x8xf32> to vector<2x8x8xf32>
    %173 = arith.addf %170, %172 : vector<2x8x8xf32>
    %cst_55 = arith.constant dense<0xFF800000> : vector<2x8xf32>
    %174 = vector.multi_reduction <maximumf>, %173, %cst_55 [2] : vector<2x8x8xf32> to vector<2x8xf32>
    %175 = vector.shape_cast %174 : vector<2x8xf32> to vector<2x8x1xf32>
    %176 = vector.broadcast %175 : vector<2x8x1xf32> to vector<2x8x8xf32>
    %177 = arith.subf %173, %176 : vector<2x8x8xf32>
    %178 = math.exp %177 : vector<2x8x8xf32>
    %cst_56 = arith.constant dense<0.000000e+00> : vector<2x8xf32>
    %179 = vector.multi_reduction <add>, %178, %cst_56 [2] : vector<2x8x8xf32> to vector<2x8xf32>
    %180 = vector.shape_cast %179 : vector<2x8xf32> to vector<2x8x1xf32>
    %181 = tpu.reciprocal %180 : vector<2x8x1xf32> -> vector<2x8x1xf32>
    %182 = vector.broadcast %181 : vector<2x8x1xf32> to vector<2x8x8xf32>
    %183 = arith.mulf %178, %182 : vector<2x8x8xf32>
    "tpu.trace_start"() <{level = 10 : i32, message = "bqk,bkd->bqd"}> : () -> ()
    %cst_57 = arith.constant dense<0.000000e+00> : vector<2x8x16xf32>
    %184 = tpu.matmul %183, %167, %cst_57 {dimension_numbers = #tpu.dot_dimension_numbers<[2], [1], [1], [2], [0, 0, 0, 1, 1, 2], [0], [0]>} : vector<2x8x8xf32>, vector<2x8x16xf32>, vector<2x8x16xf32> -> vector<2x8x16xf32>
    "tpu.trace_stop"() : () -> ()
    %185 = vector.shape_cast %184 : vector<2x8x16xf32> to vector<16x16xf32>
    %186 = tpu.concatenate %161, %185 in 1 : vector<16x16xf32>, vector<16x16xf32> -> vector<16x32xf32>
    %c1_58 = arith.constant 1 : index
    %c0_59 = arith.constant 0 : index
    %c0_60 = arith.constant 0 : index
    %187 = vector.load %arg3[%c1_58, %c0_59, %c0_60] : memref<2x32x32xf32, #tpu.memory_space<vmem>>, vector<1x32x32xf32>
    %188 = vector.shape_cast %187 : vector<1x32x32xf32> to vector<32x32xf32>
    %cst_61 = arith.constant dense<0.000000e+00> : vector<16x32xf32>
    %189 = tpu.matmul %186, %188, %cst_61 {dimension_numbers = #tpu.dot_dimension_numbers<[1], [0], [0], [1], [0, 0, 1, 1], [], []>} : vector<16x32xf32>, vector<32x32xf32>, vector<16x32xf32> -> vector<16x32xf32>
    %c1_62 = arith.constant 1 : index
    %c0_63 = arith.constant 0 : index
    %c0_64 = arith.constant 0 : index
    %190 = vector.load %arg6[%c1_62, %c0_63, %c0_64] : memref<2x4x32xf32, #tpu.memory_space<vmem>>, vector<1x4x32xf32>
    %191 = vector.shape_cast %190 : vector<1x4x32xf32> to vector<4x32xf32>
    %192 = arith.addf %189, %131 : vector<16x32xf32>
    %193 = vector.extract_strided_slice %191 {offsets = [0, 0], sizes = [1, 32], strides = [1, 1]} : vector<4x32xf32> to vector<1x32xf32>
    %194 = vector.extract_strided_slice %191 {offsets = [1, 0], sizes = [1, 32], strides = [1, 1]} : vector<4x32xf32> to vector<1x32xf32>
    %cst_65 = arith.constant dense<0.000000e+00> : vector<16xf32>
    %195 = vector.multi_reduction <add>, %192, %cst_65 [1] : vector<16x32xf32> to vector<16xf32>
    %196 = vector.shape_cast %195 : vector<16xf32> to vector<16x1xf32>
    %cst_66 = arith.constant 3.200000e+01 : f32
    %197 = vector.broadcast %cst_66 : f32 to vector<16x1xf32>
    %198 = arith.divf %196, %197 : vector<16x1xf32>
    %199 = vector.broadcast %198 : vector<16x1xf32> to vector<16x32xf32>
    %200 = arith.subf %192, %199 : vector<16x32xf32>
    %201 = arith.mulf %200, %200 : vector<16x32xf32>
    %cst_67 = arith.constant dense<0.000000e+00> : vector<16xf32>
    %202 = vector.multi_reduction <add>, %201, %cst_67 [1] : vector<16x32xf32> to vector<16xf32>
    %203 = vector.shape_cast %202 : vector<16xf32> to vector<16x1xf32>
    %cst_68 = arith.constant 3.200000e+01 : f32
    %204 = vector.broadcast %cst_68 : f32 to vector<16x1xf32>
    %205 = arith.divf %203, %204 : vector<16x1xf32>
    %206 = vector.broadcast %198 : vector<16x1xf32> to vector<16x32xf32>
    %207 = arith.subf %192, %206 : vector<16x32xf32>
    %cst_69 = arith.constant 9.99999974E-6 : f32
    %208 = vector.broadcast %cst_69 : f32 to vector<16x1xf32>
    %209 = arith.addf %205, %208 : vector<16x1xf32>
    %210 = math.rsqrt %209 : vector<16x1xf32>
    %211 = vector.broadcast %210 : vector<16x1xf32> to vector<16x32xf32>
    %212 = arith.mulf %207, %211 : vector<16x32xf32>
    %213 = vector.broadcast %193 : vector<1x32xf32> to vector<16x32xf32>
    %214 = arith.mulf %212, %213 : vector<16x32xf32>
    %215 = vector.broadcast %194 : vector<1x32xf32> to vector<16x32xf32>
    %216 = arith.addf %214, %215 : vector<16x32xf32>
    %c1_70 = arith.constant 1 : index
    %c0_71 = arith.constant 0 : index
    %c0_72 = arith.constant 0 : index
    %217 = vector.load %arg4[%c1_70, %c0_71, %c0_72] : memref<2x32x64xf32, #tpu.memory_space<vmem>>, vector<1x32x64xf32>
    %218 = vector.shape_cast %217 : vector<1x32x64xf32> to vector<32x64xf32>
    %cst_73 = arith.constant dense<0.000000e+00> : vector<16x64xf32>
    %219 = tpu.matmul %216, %218, %cst_73 {dimension_numbers = #tpu.dot_dimension_numbers<[1], [0], [0], [1], [0, 0, 1, 1], [], []>} : vector<16x32xf32>, vector<32x64xf32>, vector<16x64xf32> -> vector<16x64xf32>
    %cst_74 = arith.constant 0.000000e+00 : f32
    %220 = vector.broadcast %cst_74 : f32 to vector<16x64xf32>
    %221 = arith.maximumf %219, %220 : vector<16x64xf32>
    %c1_75 = arith.constant 1 : index
    %c0_76 = arith.constant 0 : index
    %c0_77 = arith.constant 0 : index
    %222 = vector.load %arg5[%c1_75, %c0_76, %c0_77] : memref<2x64x32xf32, #tpu.memory_space<vmem>>, vector<1x64x32xf32>
    %223 = vector.shape_cast %222 : vector<1x64x32xf32> to vector<64x32xf32>
    %cst_78 = arith.constant dense<0.000000e+00> : vector<16x32xf32>
    %224 = tpu.matmul %221, %223, %cst_78 {dimension_numbers = #tpu.dot_dimension_numbers<[1], [0], [0], [1], [0, 0, 1, 1], [], []>} : vector<16x64xf32>, vector<64x32xf32>, vector<16x32xf32> -> vector<16x32xf32>
    %225 = arith.addf %224, %216 : vector<16x32xf32>
    %226 = vector.extract_strided_slice %191 {offsets = [2, 0], sizes = [1, 32], strides = [1, 1]} : vector<4x32xf32> to vector<1x32xf32>
    %227 = vector.extract_strided_slice %191 {offsets = [3, 0], sizes = [1, 32], strides = [1, 1]} : vector<4x32xf32> to vector<1x32xf32>
    %cst_79 = arith.constant dense<0.000000e+00> : vector<16xf32>
    %228 = vector.multi_reduction <add>, %225, %cst_79 [1] : vector<16x32xf32> to vector<16xf32>
    %229 = vector.shape_cast %228 : vector<16xf32> to vector<16x1xf32>
    %cst_80 = arith.constant 3.200000e+01 : f32
    %230 = vector.broadcast %cst_80 : f32 to vector<16x1xf32>
    %231 = arith.divf %229, %230 : vector<16x1xf32>
    %232 = vector.broadcast %231 : vector<16x1xf32> to vector<16x32xf32>
    %233 = arith.subf %225, %232 : vector<16x32xf32>
    %234 = arith.mulf %233, %233 : vector<16x32xf32>
    %cst_81 = arith.constant dense<0.000000e+00> : vector<16xf32>
    %235 = vector.multi_reduction <add>, %234, %cst_81 [1] : vector<16x32xf32> to vector<16xf32>
    %236 = vector.shape_cast %235 : vector<16xf32> to vector<16x1xf32>
    %cst_82 = arith.constant 3.200000e+01 : f32
    %237 = vector.broadcast %cst_82 : f32 to vector<16x1xf32>
    %238 = arith.divf %236, %237 : vector<16x1xf32>
    %239 = vector.broadcast %231 : vector<16x1xf32> to vector<16x32xf32>
    %240 = arith.subf %225, %239 : vector<16x32xf32>
    %cst_83 = arith.constant 9.99999974E-6 : f32
    %241 = vector.broadcast %cst_83 : f32 to vector<16x1xf32>
    %242 = arith.addf %238, %241 : vector<16x1xf32>
    %243 = math.rsqrt %242 : vector<16x1xf32>
    %244 = vector.broadcast %243 : vector<16x1xf32> to vector<16x32xf32>
    %245 = arith.mulf %240, %244 : vector<16x32xf32>
    %246 = vector.broadcast %226 : vector<1x32xf32> to vector<16x32xf32>
    %247 = arith.mulf %245, %246 : vector<16x32xf32>
    %248 = vector.broadcast %227 : vector<1x32xf32> to vector<16x32xf32>
    %249 = arith.addf %247, %248 : vector<16x32xf32>
    %c0_84 = arith.constant 0 : index
    %c0_85 = arith.constant 0 : index
    %250 = vector.load %arg7[%c0_84, %c0_85] : memref<16x32xf32, #tpu.memory_space<vmem>>, vector<16x32xf32>
    tpu.vector_store %arg7[%c0_84, %c0_85], %249 {strides = array<i32>} : memref<16x32xf32, #tpu.memory_space<vmem>>, vector<16x32xf32>,
    return
  }
}

</mosaic_0001>

<bundles_post_ra>
// kernel: tpu_custom_call.1
= control target key start
LH: loop header
LB: loop body
LE: loop exit
PB: predicated region body
PF: predicated region fallthrough
CT: control target
= control target key end

     0   :  { %12 = vsyncpa [#allocation3], 0  ;;  %s3436_s0 = inlined_call_operand.hbm [shape: f32[16,32], index: 0, kind: input, shape index: {}]   ;;  %s3437_s1 = inlined_call_operand.hbm [shape: f32[32,32], index: 1, kind: input, shape index: {}]   ;;  %s3438_s2 = inlined_call_operand.vmem [shape: f32[2,32,96], index: 2, kind: input, shape index: {}]   ;;  %s3439_s3 = inlined_call_operand.vmem [shape: f32[2,32,32], index: 3, kind: input, shape index: {}]   ;;  %s3440_s4 = inlined_call_operand.vmem [shape: f32[2,32,64], index: 4, kind: input, shape index: {}]   ;;  %s3441_s5 = inlined_call_operand.vmem [shape: f32[2,64,32], index: 5, kind: input, shape index: {}]   ;;  %s3442_s6 = inlined_call_operand.vmem [shape: f32[2,4,32], index: 6, kind: input, shape index: {}]   ;;  %s3443_s7 = inlined_call_operand.hbm [shape: f32[16,32], index: 7, kind: output, shape index: {}]  }
   0x1   :  { %13 = vsyncpa [#allocation6], 0 }
   0x2   :  { %14 = vsyncpa [#allocation4], 0  ;;  %s2959_s24 = smov [#allocation2]   ;;  %s2887_s28 = scalar_lea.hbm %s3436_s0, 256 }
   0x3   :  { %s20_s25 = sshll.u32 %s2959_s24, 4  ;;  %p2888_p0 = scmp.ne.s32.totalorder %s3436_s0, %s2887_s28  ;;  %s21_s25 = int_to_ptr.vmem [resolvable:$true] %s20_s25 }
   0x4   :  { %p2891_p1 = scmp.lt.u32.totalorder %s2887_s28, %s3436_s0 }
   0x6   :  { %p2893_p2 = pnand %p2891_p1, %p2888_p0 }
   0x8   :  { %2896 = shalt.err (!%p2893_p2)
}
   0x9   :  { %s2897_s10 = scalar_lea.vmem %s21_s25, 256  ;;  %p2902_p4 = scmp.lt.s32.totalorder %s21_s25, %s21_s25 }
   0xa   :  { %p2898_p3 = scmp.ne.s32.totalorder %s21_s25, %s2897_s10  ;;  %p2903_p5 = scmp.lt.s32.totalorder %s2897_s10, %s2897_s10 }
   0xc   :  { %p2904_p6 = por %p2903_p5, %p2902_p4 }
   0xe   :  { %p2905_p7 = pnand %p2904_p6, %p2898_p3 }
  0x10   :  { %2908 = shalt.err (!%p2905_p7)
}
  0x11   :  { %s2960_s11 = smov 128   ;;  %s2961_s12 = smov 8  }
  0x12   :  { %26 = dma.hbm_to_vmem [thread:$0]  %s3436_s0, 256, %s21_s25, [#allocation3], %s2960_s11, %s2960_s11, %s2961_s12  }
  0x13   :  { %s2962_s15 = smov [#allocation5]   ;;  %s2909_s19 = scalar_lea.hbm %s3437_s1, 512 }
  0x14   :  { %s32_s16 = sshll.u32 %s2962_s15, 4  ;;  %p2910_p8 = scmp.ne.s32.totalorder %s3437_s1, %s2909_s19  ;;  %s33_s16 = int_to_ptr.vmem [resolvable:$true] %s32_s16 }
  0x15   :  { %p2913_p9 = scmp.lt.u32.totalorder %s2909_s19, %s3437_s1 }
  0x17   :  { %p2915_p10 = pnand %p2913_p9, %p2910_p8 }
  0x19   :  { %2918 = shalt.err (!%p2915_p10)
}
  0x1a   :  { %s2919_s24 = scalar_lea.vmem %s33_s16, 512  ;;  %p2924_p12 = scmp.lt.s32.totalorder %s33_s16, %s33_s16 }
  0x1b   :  { %p2920_p11 = scmp.ne.s32.totalorder %s33_s16, %s2919_s24  ;;  %p2925_p13 = scmp.lt.s32.totalorder %s2919_s24, %s2919_s24 }
  0x1d   :  { %p2926_p0 = por %p2925_p13, %p2924_p12 }
  0x1f   :  { %p2927_p1 = pnand %p2926_p0, %p2920_p11 }
  0x21   :  { %2930 = shalt.err (!%p2927_p1)
}
  0x22   :  { %38 = dma.hbm_to_vmem [thread:$0]  %s3437_s1, 512, %s33_s16, [#allocation6], %s2960_s11, %s2960_s11, %s2961_s12  }
  0x23   :  { %2953 = dma.done.wait [#allocation3], 256  }
  0x24   :  { %2954 = vsyncadd [#allocation3], 4294967040 }
  0x25   :  { %2955 = dma.done.wait [#allocation6], 512  }
  0x26   :  { %2956 = vsyncadd [#allocation6], 4294966784  ;;  %vm61_vm0 = vcmask 261120   ;;  %v57_v0 = vld [vmem:[#allocation5] sm:$0xff]  ;;  %v58_v1 = vld [vmem:[#allocation5 + $0x8] sm:$0xff]  ;;  %v2963_v18 = vmov 0.0   ;;  %v145_v23 = vlaneseq }
  0x27   :  { %v59_v2 = vld [vmem:[#allocation5 + $0x10] sm:$0xff]  ;;  %v2733_v3 = vpack.c.bf16 %v58_v1, %v57_v0  ;;  %v60_v4 = vld [vmem:[#allocation5 + $0x18] sm:$0xff]  ;;  %v156_v10 = vld [vmem:[%s3438_s2 + $0x10] sm:$0xff]  ;;  %2560 = vmatprep.subr.mxu0 %v2963_v18  ;;  %vm2964_vm1 = vmmov 0   ;;  %s2965_s10 = smov 96   ;;  %vm242_vm2 = vcmask 130048  }
  0x28   :  { %v55_v5 = vld [vmem:[#allocation2] sm:$0xff]  ;;  %v2737_v6 = vpack.c.bf16 %v60_v4, %v59_v2  ;;  %v56_v7 = vld [vmem:[#allocation2 + $0x8] sm:$0xff]  ;;  %v157_v12 = vld [vmem:[%s3438_s2 + $0x18] sm:$0xff]  ;;  %2562 = vmatprep.mubr.msk.f32.mxu0 %vm2964_vm1, %v2963_v18  ;;  %v3091_v24 = vshrl.u32 %v145_v23, 7  ;;  %v148_v25 = vand.u32 127, %v145_v23  ;;  %vm398_vm6 = vcmask 64512  }
  0x29   :  { %2546 = vmatprep.mubr.msk.f32.mxu1 %vm61_vm0, %v55_v5  ;;  %2734 = vmatprep.subr.bf16.mxu1 %v2733_v3  ;;  %v154_v8 = vld [vmem:[%s3438_s2] sm:$0xff]  ;;  %v155_v9 = vld [vmem:[%s3438_s2 + $0x8] sm:$0xff]  ;;  %v2745_v13 = vpack.c.bf16 %v157_v12, %v156_v10  ;;  %v2966_v28 = vmov -1e+09   ;;  %s2967_s13 = smov 64   ;;  %s2968_s14 = smov 80  }
  0x2a   :  { %2736 = vmatpush3.bf16.msra.mxu1 %v2733_v3  ;;  %v2741_v11 = vpack.c.bf16 %v155_v9, %v154_v8  ;;  %v150_v26 = vsub.s32 %v3091_v24, %v148_v25  ;;  %vm149_vm3 = vcmp.le.s32.totalorder %v148_v25, %v3091_v24  ;;  %s2969_s15 = smov 112   ;;  %s2970_s16 = smov 48   ;;  %vm1137_vm7 = vcmask 523264  }
  0x2b   :  { %2738 = vmatprep.subr.bf16.mxu1 %v2737_v6  ;;  %s2971_s0 = smov 16  }
  0x2c   :  { %vm151_vm4 = vcmp.lt.s32.totalorder %v150_v26, 5 }
  0x2d   :  { %vm152_vm5 = vmand %vm149_vm3, %vm151_vm4 }
  0x2e   :  { %2740 = vmatpush3.bf16.msra.mxu1 %v2737_v6  ;;  %v3095_v29 = vsel %vm152_vm5, 0.0, %v2966_v28 }
  0x2f   :  { %2742 = vmatprep.subr.bf16.mxu1 %v2741_v11 }
  0x31   :  { %2547 = vmatmul.mubr.msk.f32.vlgmr.msra.gmra.mrb[0].mxu1 %vm61_vm0, %v56_v7 }
  0x32   :  { %2744 = vmatpush3.bf16.msra.mxu1 %v2741_v11 }
  0x33   :  { %2746 = vmatprep.subr.bf16.mxu1 %v2745_v13 }
  0x36   :  { %2748 = vmatpush3.bf16.msra.mxu1 %v2745_v13 }
  0x37   :  { %2565 = vmatprep.subr.mxu1 %v2963_v18 }
 0x104   :  { %v2548_v14 = vpop.f32.mrb[0].mxu1 }
 0x105   :  { %v134_v15 = vpop.f32.mrb[1].mxu1 }
 0x106   :  { %2835 = vtanh.f32 %v134_v15 }
 0x107   :  { %2837 = vtanh.f32 %v2548_v14 }
 0x110   :  { %v3057_v16 = vpop.eup %2835 }
 0x111   :  { %v3059_v17 = vpop.eup %2837  ;;  %2557 = vmatprep.mubr.msk.f32.mxu1 %vm61_vm0, %v3057_v16 }
 0x112   :  { %2558 = vmatmul.mubr.msk.f32.vlgmr.msra.gmra.mrb[2].mxu1 %vm61_vm0, %v3059_v17 }
 0x113   :  { %2567 = vmatprep.mubr.msk.f32.mxu1 %vm2964_vm1, %v2963_v18 }
 0x1e5   :  { %v3071_v19 = vpop.f32.mrb[2].mxu1 }
 0x1e6   :  { %v3073_v20 = vpop.f32.mrb[3].mxu1 }
 0x1e7   :  { %240 = vrot.lane.b32.xlu0 %v3073_v20, %s2965_s10 }
 0x1eb   :  { %318 = vrot.lane.b32.xlu0 %v3071_v19, %s2965_s10 }
 0x259   :  { %v241_v21 = vpop.permute.xlu0 %240 }
 0x25a   :  { %2561 = vmatpush3.xpose.msk.msra.mxu0 %vm242_vm2, %v241_v21 }
 0x25b   :  { %2570 = vmatprep.subr.mxu0 %v2963_v18 }
 0x25d   :  { %2563 = vmatmul.mubr.msk.f32.vlgmr.msra.gmra.mrb[0].mxu0 %vm242_vm2, %v3073_v20  ;;  %v319_v22 = vpop.permute.xlu0 %318 }
 0x25e   :  { %2566 = vmatpush3.xpose.msk.msra.mxu1 %vm242_vm2, %v319_v22  ;;  %2572 = vmatprep.mubr.msk.f32.mxu0 %vm2964_vm1, %v2963_v18 }
 0x25f   :  { %2575 = vmatprep.subr.mxu1 %v2963_v18 }
 0x261   :  { %2568 = vmatmul.mubr.msk.f32.vlgmr.msra.gmra.mrb[4].mxu1 %vm242_vm2, %v3071_v19 }
 0x262   :  { %2577 = vmatprep.mubr.msk.f32.mxu1 %vm2964_vm1, %v2963_v18 }
 0x330   :  { %v313_v27 = vpop.f32.mrb[0].mxu0 }
 0x331   :  { %v394_v30 = vmul.f32 0.25, %v313_v27  ;;  %v2564_v31 = vpop.f32.mrb[1].mxu0 }
 0x333   :  { %v396_v32 = vadd.f32 %v394_v30, %v3095_v29 }
 0x334   :  { %v390_v33 = vpop.f32.mrb[4].mxu1 }
 0x335   :  { %v395_v34 = vmul.f32 0.25, %v390_v33  ;;  %v2569_v35 = vpop.f32.mrb[5].mxu1  ;;  %v399_v36 = vsel %vm398_vm6, %v396_v32, -inf }
 0x336   :  { %400 = vmax.xlane.f32.xlu1 %v399_v36  ;;  %v917_v35 = vld [vmem:[%s3439_s3] sm:$0xff] }
 0x337   :  { %v397_v37 = vadd.f32 %v395_v34, %v3095_v29 }
 0x339   :  { %v402_v38 = vsel %vm398_vm6, %v397_v37, -inf }
 0x33a   :  { %403 = vmax.xlane.f32.xlu1 %v402_v38  ;;  %v920_v38 = vld [vmem:[%s3439_s3 + $0x18] sm:$0xff] }
 0x34b   :  { %421 = vrot.lane.b32.xlu1 %v3073_v20, %s2967_s13 }
 0x34f   :  { %497 = vrot.lane.b32.xlu1 %v3071_v19, %s2967_s13 }
 0x353   :  { %575 = vrot.lane.b32.xlu1 %v3073_v20, %s2968_s14 }
 0x357   :  { %653 = vrot.lane.b32.xlu1 %v3071_v19, %s2968_s14 }
 0x3c3   :  { %v401_v39 = vpop.xlane.xlu1 %400 }
 0x3c4   :  { %v405_v40 = vsub.f32 %v396_v32, %v401_v39 }
 0x3c6   :  { %v407_v41 = vmul.f32 1.442695, %v405_v40 }
 0x3c7   :  { %v404_v42 = vpop.xlane.xlu1 %403 }
 0x3c8   :  { %2839 = vpow2.f32 %v407_v41  ;;  %v406_v43 = vsub.f32 %v397_v37, %v404_v42  ;;  %v919_v37 = vld [vmem:[%s3439_s3 + $0x10] sm:$0xff] }
 0x3c9   :  { %v2753_v39 = vpack.c.bf16 %v920_v38, %v919_v37  ;;  %v1135_v37 = vld [vmem:[%s3441_s5 + $0x30] sm:$0xff]  ;;  %v1136_v38 = vld [vmem:[%s3441_s5 + $0x38] sm:$0xff] }
 0x3ca   :  { %v409_v44 = vmul.f32 1.442695, %v406_v43 }
 0x3cb   :  { %v422_v45 = vpop.permute.xlu1 %421 }
 0x3cc   :  { %2841 = vpow2.f32 %v409_v44  ;;  %2571 = vmatpush3.msra.mxu0 %v422_v45 }
 0x3cd   :  { %2580 = vmatprep.subr.mxu0 %v2963_v18 }
 0x3cf   :  { %v498_v46 = vpop.permute.xlu1 %497 }
 0x3d0   :  { %2576 = vmatpush3.msra.mxu1 %v498_v46 }
 0x3d1   :  { %2585 = vmatprep.subr.mxu1 %v2963_v18 }
 0x3d2   :  { %v2840_v47 = vpop.eup %2839 }
 0x3d3   :  { %v411_v48 = vsel %vm398_vm6, %v2840_v47, 0.0  ;;  %v576_v51 = vpop.permute.xlu1 %575 }
 0x3d4   :  { %412 = vadd.xlane.f32.xlu0 %v411_v48 }
 0x3d6   :  { %v2842_v49 = vpop.eup %2841 }
 0x3d7   :  { %v414_v50 = vsel %vm398_vm6, %v2842_v49, 0.0  ;;  %v654_v52 = vpop.permute.xlu1 %653 }
 0x3d8   :  { %415 = vadd.xlane.f32.xlu1 %v414_v50 }
 0x3e9   :  { %651 = vrot.lane.b32.xlu1 %v3071_v19, %s2969_s15 }
 0x3ea   :  { %573 = vrot.lane.b32.xlu0 %v3073_v20, %s2969_s15 }
 0x461   :  { %v413_v53 = vpop.xlane.xlu0 %412 }
 0x462   :  { %2843 = vrcp.f32 %v413_v53 }
 0x465   :  { %v416_v54 = vpop.xlane.xlu1 %415  ;;  %v574_v59 = vpop.permute.xlu0 %573 }
 0x466   :  { %2845 = vrcp.f32 %v416_v54 }
 0x469   :  { %v652_v60 = vpop.permute.xlu1 %651 }
 0x46c   :  { %v2844_v55 = vpop.eup %2843 }
 0x46d   :  { %v419_v56 = vmul.f32 %v2844_v55, %v2840_v47 }
 0x46f   :  { %2573 = vmatmul.mubr.msk.f32.vlgmr.msra.gmra.mrb[2].mxu0 %vm398_vm6, %v419_v56 }
 0x470   :  { %v2846_v57 = vpop.eup %2845  ;;  %2581 = vmatpush3.xpose.msk.msra.mxu0 %vm242_vm2, %v576_v51  ;;  %2582 = vmatprep.mubr.msk.f32.mxu0 %vm2964_vm1, %v2963_v18 }
 0x471   :  { %v420_v58 = vmul.f32 %v2846_v57, %v2842_v49  ;;  %2590 = vmatprep.subr.mxu0 %v2963_v18 }
 0x473   :  { %2578 = vmatmul.mubr.msk.f32.vlgmr.msra.gmra.mrb[6].mxu1 %vm398_vm6, %v420_v58  ;;  %2583 = vmatmul.mubr.msk.f32.vlgmr.msra.gmra.mrb[4].mxu0 %vm242_vm2, %v574_v59 }
 0x474   :  { %2586 = vmatpush3.xpose.msk.msra.mxu1 %vm242_vm2, %v654_v52  ;;  %2587 = vmatprep.mubr.msk.f32.mxu1 %vm2964_vm1, %v2963_v18 }
 0x475   :  { %2595 = vmatprep.subr.mxu1 %v2963_v18  ;;  %2592 = vmatprep.mubr.msk.f32.mxu0 %vm2964_vm1, %v2963_v18 }
 0x477   :  { %2588 = vmatmul.mubr.msk.f32.vlgmr.msra.gmra.mrb[8].mxu1 %vm242_vm2, %v652_v60 }
 0x478   :  { %2597 = vmatprep.mubr.msk.f32.mxu1 %vm2964_vm1, %v2963_v18 }
 0x542   :  { %v3133_v61 = vpop.f32.mrb[2].mxu0 }
 0x543   :  { %v2574_v62 = vpop.f32.mrb[3].mxu0 }
 0x546   :  { %v3135_v63 = vpop.f32.mrb[6].mxu1  ;;  %v647_v0 = vpop.f32.mrb[4].mxu0 }
 0x547   :  { %v729_v1 = vmul.f32 0.25, %v647_v0  ;;  %v2579_v2 = vpop.f32.mrb[7].mxu1  ;;  %v2584_v3 = vpop.f32.mrb[5].mxu0 }
 0x548   :  { %v1045_v2 = vld [vmem:[%s3440_s4 + $0x18] sm:$0xff] }
 0x549   :  { %v731_v4 = vadd.f32 %v729_v1, %v3095_v29  ;;  %v1044_v1 = vld [vmem:[%s3440_s4 + $0x10] sm:$0xff] }
 0x54a   :  { %v725_v5 = vpop.f32.mrb[8].mxu1  ;;  %v2761_v3 = vpack.c.bf16 %v1045_v2, %v1044_v1 }
 0x54b   :  { %v730_v6 = vmul.f32 0.25, %v725_v5  ;;  %v2589_v7 = vpop.f32.mrb[9].mxu1  ;;  %v733_v8 = vsel %vm398_vm6, %v731_v4, -inf  ;;  %v1130_v5 = vld [vmem:[%s3441_s5 + $0x8] sm:$0xff] }
 0x54c   :  { %734 = vmax.xlane.f32.xlu1 %v733_v8  ;;  %v1132_v8 = vld [vmem:[%s3441_s5 + $0x18] sm:$0xff] }
 0x54d   :  { %v732_v9 = vadd.f32 %v730_v6, %v3095_v29  ;;  %v1131_v6 = vld [vmem:[%s3441_s5 + $0x10] sm:$0xff] }
 0x54f   :  { %v736_v10 = vsel %vm398_vm6, %v732_v9, -inf }
 0x550   :  { %737 = vmax.xlane.f32.xlu0 %v736_v10  ;;  %v1133_v10 = vld [vmem:[%s3441_s5 + $0x20] sm:$0xff] }
 0x566   :  { %831 = vrot.lane.b32.xlu0 %v3071_v19, %s2970_s16 }
 0x5d9   :  { %v735_v11 = vpop.xlane.xlu1 %734 }
 0x5da   :  { %v739_v12 = vsub.f32 %v731_v4, %v735_v11  ;;  %v1129_v4 = vld [vmem:[%s3441_s5] sm:$0xff]  ;;  %v1134_v11 = vld [vmem:[%s3441_s5 + $0x28] sm:$0xff] }
 0x5db   :  { %v2765_v7 = vpack.c.bf16 %v1130_v5, %v1129_v4 }
 0x5dc   :  { %v741_v15 = vmul.f32 1.442695, %v739_v12  ;;  %v2773_v12 = vpack.c.bf16 %v1134_v11, %v1133_v10 }
 0x5dd   :  { %v738_v13 = vpop.xlane.xlu0 %737 }
 0x5de   :  { %v740_v14 = vsub.f32 %v732_v9, %v738_v13  ;;  %v2769_v9 = vpack.c.bf16 %v1132_v8, %v1131_v6  ;;  %v1247_v6 = vsub.s32 2, %v3091_v24 }
 0x5e0   :  { %v743_v21 = vmul.f32 1.442695, %v740_v14 }
 0x5e1   :  { %v832_v22 = vpop.permute.xlu0 %831 }
 0x5e2   :  { %2847 = vpow2.f32 %v743_v21  ;;  %2596 = vmatpush3.msra.mxu1 %v832_v22 }
 0x5e3   :  { %2849 = vpow2.f32 %v741_v15 }
 0x5ec   :  { %v2848_v23 = vpop.eup %2847 }
 0x5ed   :  { %v748_v25 = vsel %vm398_vm6, %v2848_v23, 0.0  ;;  %v2850_v26 = vpop.eup %2849 }
 0x5ee   :  { %749 = vadd.xlane.f32.xlu1 %v748_v25  ;;  %v745_v27 = vsel %vm398_vm6, %v2850_v26, 0.0  ;;  %v1032_v25 = vsub.s32 0, %v3091_v24 }
 0x5f2   :  { %746 = vadd.xlane.f32.xlu1 %v745_v27  ;;  %v1038_v27 = vsub.s32 1, %v3091_v24 }
 0x603   :  { %755 = vrot.lane.b32.xlu1 %v3073_v20, %s2970_s16  ;;  %v918_v20 = vld [vmem:[%s3439_s3 + $0x8] sm:$0xff] }
 0x604   :  { %v2749_v36 = vpack.c.bf16 %v918_v20, %v917_v35 }
 0x67b   :  { %v750_v19 = vpop.xlane.xlu1 %749 }
 0x67c   :  { %2851 = vrcp.f32 %v750_v19 }
 0x67f   :  { %v747_v28 = vpop.xlane.xlu1 %746 }
 0x680   :  { %2853 = vrcp.f32 %v747_v28 }
 0x683   :  { %v756_v30 = vpop.permute.xlu1 %755 }
 0x684   :  { %2591 = vmatpush3.msra.mxu0 %v756_v30 }
 0x685   :  { %2750 = vmatprep.subr.bf16.mxu0 %v2749_v36 }
 0x686   :  { %v2852_v31 = vpop.eup %2851 }
 0x687   :  { %v754_v32 = vmul.f32 %v2852_v31, %v2848_v23 }
 0x689   :  { %2598 = vmatmul.mubr.msk.f32.vlgmr.msra.gmra.mrb[10].mxu1 %vm398_vm6, %v754_v32 }
 0x68a   :  { %v2854_v33 = vpop.eup %2853 }
 0x68b   :  { %v753_v34 = vmul.f32 %v2854_v33, %v2850_v26  ;;  %v3209_v26 = vld [vmem:[%s3442_s6] sm:$0xf] }
 0x68c   :  { %v1033_v19 = vrot.slane %v3209_v26, %v1032_v25  ;;  %v1039_v31 = vrot.slane %v3209_v26, %v1038_v27  ;;  %v1248_v8 = vrot.slane %v3209_v26, %v1247_v6 }
 0x68d   :  { %2593 = vmatmul.mubr.msk.f32.vlgmr.msra.gmra.mrb[6].mxu0 %vm398_vm6, %v753_v34 }
 0x68e   :  { %2752 = vmatpush3.bf16.msra.mxu0 %v2749_v36 }
 0x68f   :  { %2754 = vmatprep.subr.bf16.mxu0 %v2753_v39 }
 0x692   :  { %2756 = vmatpush3.bf16.msra.mxu0 %v2753_v39  ;;  %v2777_v39 = vpack.c.bf16 %v1136_v38, %v1135_v37 }
 0x693   :  { %2766 = vmatprep.subr.bf16.mxu0 %v2765_v7 }
 0x75c   :  { %v903_v40 = vpop.f32.mrb[10].mxu1 }
 0x75d   :  { %v2599_v41 = vpop.f32.mrb[11].mxu1 }
 0x760   :  { %v827_v42 = vpop.f32.mrb[6].mxu0 }
 0x761   :  { %909 = vrot.lane.b32.xlu1 %v827_v42, %s2971_s0  ;;  %v2594_v43 = vpop.f32.mrb[7].mxu0 }
 0x765   :  { %911 = vrot.lane.b32.xlu1 %v903_v40, %s2971_s0 }
 0x7d3   :  { %v910_v44 = vpop.permute.xlu1 %909 }
 0x7d4   :  { %v915_v45 = vsel %vm242_vm2, %v3133_v61, %v910_v44 }
 0x7d5   :  { %2608 = vmatprep.mubr.msk.f32.mxu0 %vm61_vm0, %v915_v45 }
 0x7d7   :  { %v912_v46 = vpop.permute.xlu1 %911 }
 0x7d8   :  { %v916_v47 = vsel %vm242_vm2, %v3135_v63, %v912_v46  ;;  %v1043_v63 = vld [vmem:[%s3440_s4 + $0x8] sm:$0xff] }
 0x7d9   :  { %2609 = vmatmul.mubr.msk.f32.vlgmr.msra.gmra.mrb[8].mxu0 %vm61_vm0, %v916_v47 }
 0x7da   :  { %2768 = vmatpush3.bf16.msra.mxu0 %v2765_v7  ;;  %v1253_v7 = vsub.s32 3, %v3091_v24 }
 0x7db   :  { %2770 = vmatprep.subr.bf16.mxu0 %v2769_v9 }
 0x7de   :  { %2772 = vmatpush3.bf16.msra.mxu0 %v2769_v9 }
 0x7df   :  { %2774 = vmatprep.subr.bf16.mxu0 %v2773_v12 }
 0x7e2   :  { %2776 = vmatpush3.bf16.msra.mxu0 %v2773_v12 }
 0x7e3   :  { %2778 = vmatprep.subr.bf16.mxu0 %v2777_v39 }
 0x7e6   :  { %2780 = vmatpush3.bf16.msra.mxu0 %v2777_v39 }
 0x7e7   :  { %2662 = vmatprep.subr.mxu0 %v2963_v18 }
 0x8ac   :  { %v2610_v48 = vpop.f32.mrb[8].mxu0 }
 0x8ad   :  { %v1000_v49 = vadd.f32 %v3059_v17, %v2610_v48  ;;  %v994_v50 = vpop.f32.mrb[9].mxu0 }
 0x8ae   :  { %v995_v51 = vadd.f32 %v3057_v16, %v994_v50  ;;  %v1042_v16 = vld [vmem:[%s3440_s4] sm:$0xff] }
 0x8af   :  { %v1006_v52 = vsel %vm61_vm0, %v1000_v49, 0.0  ;;  %v2757_v0 = vpack.c.bf16 %v1043_v63, %v1042_v16  ;;  %v2406_v16 = vld [vmem:[%s3438_s2 + $0x38] sm:$0xff] }
 0x8b0   :  { %1007 = vadd.xlane.f32.xlu1 %v1006_v52  ;;  %v1003_v53 = vsel %vm61_vm0, %v995_v51, 0.0 }
 0x8b1   :  { %1004 = vadd.xlane.f32.xlu0 %v1003_v53  ;;  %2758 = vmatprep.subr.bf16.mxu1 %v2757_v0 }
 0x8b2   :  { %2760 = vmatpush3.bf16.msra.mxu1 %v2757_v0 }
 0x8b3   :  { %2762 = vmatprep.subr.bf16.mxu1 %v2761_v3 }
 0x8b6   :  { %2764 = vmatpush3.bf16.msra.mxu1 %v2761_v3 }
 0x93d   :  { %v1008_v54 = vpop.xlane.xlu1 %1007 }
 0x93e   :  { %v1011_v55 = vmul.f32 0.03125, %v1008_v54  ;;  %v1005_v56 = vpop.xlane.xlu0 %1004 }
 0x93f   :  { %v1010_v57 = vmul.f32 0.03125, %v1005_v56 }
 0x940   :  { %v1013_v58 = vsub.f32 %v1000_v49, %v1011_v55 }
 0x941   :  { %v1012_v59 = vsub.f32 %v995_v51, %v1010_v57 }
 0x942   :  { %v1015_v62 = vmul.f32 %v1013_v58, %v1013_v58 }
 0x943   :  { %v1014_v60 = vmul.f32 %v1012_v59, %v1012_v59 }
 0x944   :  { %v1019_v17 = vsel %vm61_vm0, %v1015_v62, 0.0 }
 0x945   :  { %v1016_v61 = vsel %vm61_vm0, %v1014_v60, 0.0  ;;  %v2403_v60 = vld [vmem:[%s3438_s2 + $0x20] sm:$0xff] }
 0x946   :  { %1017 = vadd.xlane.f32.xlu0 %v1016_v61  ;;  %v2404_v61 = vld [vmem:[%s3438_s2 + $0x28] sm:$0xff] }
 0x947   :  { %v2781_v62 = vpack.c.bf16 %v2404_v61, %v2403_v60 }
 0x949   :  { %2782 = vmatprep.subr.bf16.mxu1 %v2781_v62 }
 0x94a   :  { %1020 = vadd.xlane.f32.xlu0 %v1019_v17  ;;  %v2405_v17 = vld [vmem:[%s3438_s2 + $0x30] sm:$0xff] }
 0x94b   :  { %v2785_v63 = vpack.c.bf16 %v2406_v16, %v2405_v17 }
 0x9d3   :  { %v1018_v13 = vpop.xlane.xlu0 %1017 }
 0x9d4   :  { %v1022_v14 = vmul.f32 0.03125, %v1018_v13  ;;  %v1254_v13 = vrot.slane %v3209_v26, %v1253_v7 }
 0x9d6   :  { %v1024_v15 = vadd.f32 1e-05, %v1022_v14 }
 0x9d7   :  { %v1021_v21 = vpop.xlane.xlu0 %1020 }
 0x9d8   :  { %2855 = vrsqrt.f32 %v1024_v15  ;;  %v1023_v22 = vmul.f32 0.03125, %v1021_v21 }
 0x9da   :  { %v1025_v23 = vadd.f32 1e-05, %v1023_v22 }
 0x9dc   :  { %2857 = vrsqrt.f32 %v1025_v23 }
 0x9e2   :  { %v2856_v28 = vpop.eup %2855 }
 0x9e3   :  { %v1028_v30 = vmul.f32 %v2856_v28, %v1012_v59 }
 0x9e5   :  { %v1034_v32 = vmul.f32 %v1033_v19, %v1028_v30 }
 0x9e6   :  { %v2858_v33 = vpop.eup %2857 }
 0x9e7   :  { %v1029_v34 = vmul.f32 %v2858_v33, %v1013_v58  ;;  %v1040_v35 = vadd.f32 %v1039_v31, %v1034_v32 }
 0x9e9   :  { %v1035_v20 = vmul.f32 %v1033_v19, %v1029_v34  ;;  %2619 = vmatprep.mubr.msk.f32.mxu1 %vm61_vm0, %v1040_v35 }
 0x9eb   :  { %v1041_v36 = vadd.f32 %v1039_v31, %v1035_v20 }
 0x9ed   :  { %2620 = vmatmul.mubr.msk.f32.vlgmr.msra.gmra.mrb[12].mxu1 %vm61_vm0, %v1041_v36 }
 0x9ee   :  { %2784 = vmatpush3.bf16.msra.mxu1 %v2781_v62 }
 0x9ef   :  { %2786 = vmatprep.subr.bf16.mxu1 %v2785_v63 }
 0x9f2   :  { %2788 = vmatpush3.bf16.msra.mxu1 %v2785_v63 }
 0x9f3   :  { %2652 = vmatprep.subr.mxu1 %v2963_v18 }
 0xac0   :  { %v2621_v40 = vpop.f32.mrb[12].mxu1 }
 0xac1   :  { %v1118_v41 = vpop.f32.mrb[13].mxu1  ;;  %v1128_v43 = vmax.f32 %v2621_v40, 0.0 }
 0xac2   :  { %v1127_v42 = vmax.f32 %v1118_v41, 0.0 }
 0xac4   :  { %2638 = vmatprep.mubr.msk.f32.mxu0 %vm1137_vm7, %v1127_v42 }
 0xac5   :  { %2639 = vmatmul.mubr.msk.f32.vlgmr.msra.gmra.mrb[10].mxu0 %vm1137_vm7, %v1128_v43 }
 0xac6   :  { %2664 = vmatprep.mubr.msk.f32.mxu0 %vm2964_vm1, %v2963_v18 }
 0xb98   :  { %v2640_v44 = vpop.f32.mrb[10].mxu0 }
 0xb99   :  { %v1216_v45 = vadd.f32 %v2640_v44, %v1041_v36  ;;  %v1210_v46 = vpop.f32.mrb[11].mxu0 }
 0xb9a   :  { %v1211_v47 = vadd.f32 %v1210_v46, %v1040_v35 }
 0xb9b   :  { %v1222_v48 = vsel %vm61_vm0, %v1216_v45, 0.0 }
 0xb9c   :  { %1223 = vadd.xlane.f32.xlu0 %v1222_v48  ;;  %v1219_v49 = vsel %vm61_vm0, %v1211_v47, 0.0 }
 0xb9d   :  { %1220 = vadd.xlane.f32.xlu1 %v1219_v49 }
 0xc29   :  { %v1224_v50 = vpop.xlane.xlu0 %1223 }
 0xc2a   :  { %v1226_v51 = vmul.f32 0.03125, %v1224_v50  ;;  %v1221_v52 = vpop.xlane.xlu1 %1220 }
 0xc2b   :  { %v1225_v53 = vmul.f32 0.03125, %v1221_v52 }
 0xc2c   :  { %v1228_v54 = vsub.f32 %v1216_v45, %v1226_v51 }
 0xc2d   :  { %v1227_v55 = vsub.f32 %v1211_v47, %v1225_v53 }
 0xc2e   :  { %v1230_v56 = vmul.f32 %v1228_v54, %v1228_v54 }
 0xc2f   :  { %v1229_v57 = vmul.f32 %v1227_v55, %v1227_v55 }
 0xc30   :  { %v1234_v58 = vsel %vm61_vm0, %v1230_v56, 0.0 }
 0xc31   :  { %1235 = vadd.xlane.f32.xlu0 %v1234_v58  ;;  %v1231_v59 = vsel %vm61_vm0, %v1229_v57, 0.0 }
 0xc32   :  { %1232 = vadd.xlane.f32.xlu1 %v1231_v59 }
 0xcbe   :  { %v1236_v0 = vpop.xlane.xlu0 %1235 }
 0xcbf   :  { %v1238_v1 = vmul.f32 0.03125, %v1236_v0  ;;  %v1233_v2 = vpop.xlane.xlu1 %1232 }
 0xcc0   :  { %v1237_v3 = vmul.f32 0.03125, %v1233_v2 }
 0xcc1   :  { %v1240_v4 = vadd.f32 1e-05, %v1238_v1 }
 0xcc2   :  { %v1239_v5 = vadd.f32 1e-05, %v1237_v3 }
 0xcc3   :  { %2859 = vrsqrt.f32 %v1240_v4 }
 0xcc4   :  { %2861 = vrsqrt.f32 %v1239_v5 }
 0xccd   :  { %v2860_v9 = vpop.eup %2859 }
 0xcce   :  { %v2862_v10 = vpop.eup %2861  ;;  %v1244_v11 = vmul.f32 %v2860_v9, %v1228_v54 }
 0xccf   :  { %v1243_v12 = vmul.f32 %v2862_v10, %v1227_v55 }
 0xcd0   :  { %v1250_v14 = vmul.f32 %v1248_v8, %v1244_v11 }
 0xcd1   :  { %v1249_v15 = vmul.f32 %v1248_v8, %v1243_v12 }
 0xcd2   :  { %v3258_v22 = vadd.f32 %v1254_v13, %v1250_v14 }
 0xcd3   :  { %v3256_v21 = vadd.f32 %v1254_v13, %v1249_v15 }
 0xcd5   :  { %2649 = vmatprep.mubr.msk.f32.mxu1 %vm61_vm0, %v3256_v21 }
 0xcd6   :  { %2650 = vmatmul.mubr.msk.f32.vlgmr.msra.gmra.mrb[14].mxu1 %vm61_vm0, %v3258_v22 }
 0xcd7   :  { %2654 = vmatprep.mubr.msk.f32.mxu1 %vm2964_vm1, %v2963_v18 }
 0xda9   :  { %v3266_v23 = vpop.f32.mrb[14].mxu1 }
 0xdaa   :  { %1421 = vrot.lane.b32.xlu0 %v3266_v23, %s2965_s10  ;;  %v3270_v26 = vpop.f32.mrb[15].mxu1 }
 0xdab   :  { %1344 = vrot.lane.b32.xlu1 %v3270_v26, %s2965_s10 }
 0xe1c   :  { %v1422_v28 = vpop.permute.xlu0 %1421 }
 0xe1d   :  { %v1345_v19 = vpop.permute.xlu1 %1344 }
 0xe1e   :  { %2653 = vmatpush3.xpose.msk.msra.mxu1 %vm242_vm2, %v1345_v19 }
 0xe1f   :  { %2657 = vmatprep.subr.mxu1 %v2963_v18 }
 0xe21   :  { %2655 = vmatmul.mubr.msk.f32.vlgmr.msra.gmra.mrb[16].mxu1 %vm242_vm2, %v3270_v26 }
 0xe22   :  { %2658 = vmatpush3.xpose.msk.msra.mxu1 %vm242_vm2, %v1422_v28  ;;  %2659 = vmatprep.mubr.msk.f32.mxu1 %vm2964_vm1, %v2963_v18 }
 0xe23   :  { %2667 = vmatprep.subr.mxu1 %v2963_v18 }
 0xe25   :  { %2660 = vmatmul.mubr.msk.f32.vlgmr.msra.gmra.mrb[18].mxu1 %vm242_vm2, %v3266_v23 }
 0xe26   :  { %2669 = vmatprep.mubr.msk.f32.mxu1 %vm2964_vm1, %v2963_v18 }
 0xef4   :  { %v1416_v30 = vpop.f32.mrb[16].mxu1 }
 0xef5   :  { %v1497_v31 = vmul.f32 0.25, %v1416_v30  ;;  %v2656_v32 = vpop.f32.mrb[17].mxu1 }
 0xef7   :  { %v1499_v33 = vadd.f32 %v1497_v31, %v3095_v29 }
 0xef8   :  { %v1493_v34 = vpop.f32.mrb[18].mxu1 }
 0xef9   :  { %v1498_v35 = vmul.f32 0.25, %v1493_v34  ;;  %v2661_v20 = vpop.f32.mrb[19].mxu1  ;;  %v1501_v36 = vsel %vm398_vm6, %v1499_v33, -inf }
 0xefa   :  { %1502 = vmax.xlane.f32.xlu1 %v1501_v36 }
 0xefb   :  { %v1500_v37 = vadd.f32 %v1498_v35, %v3095_v29 }
 0xefd   :  { %v1504_v38 = vsel %vm398_vm6, %v1500_v37, -inf }
 0xefe   :  { %1505 = vmax.xlane.f32.xlu0 %v1504_v38 }
 0xf0b   :  { %1523 = vrot.lane.b32.xlu1 %v3270_v26, %s2967_s13 }
 0xf0f   :  { %1677 = vrot.lane.b32.xlu1 %v3270_v26, %s2968_s14 }
 0xf13   :  { %1755 = vrot.lane.b32.xlu1 %v3266_v23, %s2968_s14 }
 0xf14   :  { %1599 = vrot.lane.b32.xlu0 %v3266_v23, %s2967_s13 }
 0xf87   :  { %v1503_v39 = vpop.xlane.xlu1 %1502 }
 0xf88   :  { %v1507_v40 = vsub.f32 %v1499_v33, %v1503_v39  ;;  %v2423_v39 = vld [vmem:[%s3439_s3 + $0x30] sm:$0xff] }
 0xf8a   :  { %v1509_v41 = vmul.f32 1.442695, %v1507_v40  ;;  %v2424_v40 = vld [vmem:[%s3439_s3 + $0x38] sm:$0xff] }
 0xf8b   :  { %v1524_v42 = vpop.permute.xlu1 %1523  ;;  %v1506_v43 = vpop.xlane.xlu0 %1505 }
 0xf8c   :  { %2863 = vpow2.f32 %v1509_v41  ;;  %v1508_v44 = vsub.f32 %v1500_v37, %v1506_v43  ;;  %2663 = vmatpush3.msra.mxu0 %v1524_v42  ;;  %v2421_v37 = vld [vmem:[%s3439_s3 + $0x20] sm:$0xff]  ;;  %v2793_v41 = vpack.c.bf16 %v2424_v40, %v2423_v39  ;;  %v2440_v39 = vld [vmem:[%s3441_s5 + $0x70] sm:$0xff] }
 0xf8d   :  { %2672 = vmatprep.subr.mxu0 %v2963_v18 }
 0xf8e   :  { %v1511_v45 = vmul.f32 1.442695, %v1508_v44 }
 0xf8f   :  { %v1600_v46 = vpop.permute.xlu0 %1599  ;;  %v1678_v51 = vpop.permute.xlu1 %1677 }
 0xf90   :  { %2865 = vpow2.f32 %v1511_v45  ;;  %2668 = vmatpush3.msra.mxu1 %v1600_v46 }
 0xf91   :  { %2677 = vmatprep.subr.mxu1 %v2963_v18 }
 0xf93   :  { %v1756_v52 = vpop.permute.xlu1 %1755 }
 0xf96   :  { %v2864_v47 = vpop.eup %2863 }
 0xf97   :  { %v1513_v48 = vsel %vm398_vm6, %v2864_v47, 0.0 }
 0xf98   :  { %1514 = vadd.xlane.f32.xlu1 %v1513_v48 }
 0xf9a   :  { %v2866_v49 = vpop.eup %2865 }
 0xf9b   :  { %v1516_v50 = vsel %vm398_vm6, %v2866_v49, 0.0 }
 0xf9c   :  { %1517 = vadd.xlane.f32.xlu0 %v1516_v50 }
 0xfa9   :  { %1753 = vrot.lane.b32.xlu1 %v3266_v23, %s2969_s15 }
 0xfb2   :  { %1675 = vrot.lane.b32.xlu0 %v3270_v26, %s2969_s15 }
0x1025   :  { %v1515_v53 = vpop.xlane.xlu1 %1514 }
0x1026   :  { %2867 = vrcp.f32 %v1515_v53 }
0x1029   :  { %v1518_v54 = vpop.xlane.xlu0 %1517  ;;  %v1754_v60 = vpop.permute.xlu1 %1753 }
0x102a   :  { %2869 = vrcp.f32 %v1518_v54 }
0x102d   :  { %v1676_v59 = vpop.permute.xlu0 %1675 }
0x1030   :  { %v2868_v55 = vpop.eup %2867 }
0x1031   :  { %v1521_v56 = vmul.f32 %v2868_v55, %v2864_v47 }
0x1033   :  { %2665 = vmatmul.mubr.msk.f32.vlgmr.msra.gmra.mrb[12].mxu0 %vm398_vm6, %v1521_v56 }
0x1034   :  { %v2870_v57 = vpop.eup %2869  ;;  %2673 = vmatpush3.xpose.msk.msra.mxu0 %vm242_vm2, %v1678_v51  ;;  %2674 = vmatprep.mubr.msk.f32.mxu0 %vm2964_vm1, %v2963_v18 }
0x1035   :  { %v1522_v58 = vmul.f32 %v2870_v57, %v2866_v49  ;;  %2682 = vmatprep.subr.mxu0 %v2963_v18 }
0x1037   :  { %2670 = vmatmul.mubr.msk.f32.vlgmr.msra.gmra.mrb[20].mxu1 %vm398_vm6, %v1522_v58  ;;  %2675 = vmatmul.mubr.msk.f32.vlgmr.msra.gmra.mrb[14].mxu0 %vm242_vm2, %v1676_v59 }
0x1038   :  { %2678 = vmatpush3.xpose.msk.msra.mxu1 %vm242_vm2, %v1756_v52  ;;  %2679 = vmatprep.mubr.msk.f32.mxu1 %vm2964_vm1, %v2963_v18 }
0x1039   :  { %2687 = vmatprep.subr.mxu1 %v2963_v18  ;;  %2684 = vmatprep.mubr.msk.f32.mxu0 %vm2964_vm1, %v2963_v18 }
0x103b   :  { %2680 = vmatmul.mubr.msk.f32.vlgmr.msra.gmra.mrb[22].mxu1 %vm242_vm2, %v1754_v60 }
0x103c   :  { %2689 = vmatprep.mubr.msk.f32.mxu1 %vm2964_vm1, %v2963_v18 }
0x1106   :  { %v3322_v61 = vpop.f32.mrb[12].mxu0 }
0x1107   :  { %v2666_v62 = vpop.f32.mrb[13].mxu0 }
0x110a   :  { %v3324_v17 = vpop.f32.mrb[20].mxu1  ;;  %v1749_v16 = vpop.f32.mrb[14].mxu0 }
0x110b   :  { %v1831_v63 = vmul.f32 0.25, %v1749_v16  ;;  %v2671_v0 = vpop.f32.mrb[21].mxu1  ;;  %v2676_v1 = vpop.f32.mrb[15].mxu0 }
0x110c   :  { %v2430_v1 = vld [vmem:[%s3440_s4 + $0x30] sm:$0xff] }
0x110d   :  { %v1833_v2 = vadd.f32 %v1831_v63, %v3095_v29  ;;  %v2429_v63 = vld [vmem:[%s3440_s4 + $0x28] sm:$0xff] }
0x110e   :  { %v1827_v3 = vpop.f32.mrb[22].mxu1 }
0x110f   :  { %v1832_v4 = vmul.f32 0.25, %v1827_v3  ;;  %v2681_v5 = vpop.f32.mrb[23].mxu1  ;;  %v1835_v8 = vsel %vm398_vm6, %v1833_v2, -inf }
0x1110   :  { %1836 = vmax.xlane.f32.xlu0 %v1835_v8  ;;  %v2435_v5 = vld [vmem:[%s3441_s5 + $0x48] sm:$0xff]  ;;  %v2436_v8 = vld [vmem:[%s3441_s5 + $0x50] sm:$0xff] }
0x1111   :  { %v1834_v9 = vadd.f32 %v1832_v4, %v3095_v29  ;;  %v2434_v4 = vld [vmem:[%s3441_s5 + $0x40] sm:$0xff] }
0x1113   :  { %v1838_v18 = vsel %vm398_vm6, %v1834_v9, -inf }
0x1114   :  { %1839 = vmax.xlane.f32.xlu1 %v1838_v18  ;;  %v2437_v18 = vld [vmem:[%s3441_s5 + $0x58] sm:$0xff] }
0x1125   :  { %1857 = vrot.lane.b32.xlu1 %v3270_v26, %s2970_s16 }
0x119d   :  { %v1837_v10 = vpop.xlane.xlu0 %1836 }
0x119e   :  { %v1841_v11 = vsub.f32 %v1833_v2, %v1837_v10  ;;  %v2431_v2 = vld [vmem:[%s3440_s4 + $0x38] sm:$0xff]  ;;  %v2809_v10 = vpack.c.bf16 %v2437_v18, %v2436_v8 }
0x119f   :  { %v2801_v3 = vpack.c.bf16 %v2431_v2, %v2430_v1 }
0x11a0   :  { %v1843_v12 = vmul.f32 1.442695, %v1841_v11  ;;  %v2438_v11 = vld [vmem:[%s3441_s5 + $0x60] sm:$0xff] }
0x11a1   :  { %v1840_v13 = vpop.xlane.xlu1 %1839 }
0x11a2   :  { %2871 = vpow2.f32 %v1843_v12  ;;  %v1842_v14 = vsub.f32 %v1834_v9, %v1840_v13  ;;  %v2805_v9 = vpack.c.bf16 %v2435_v5, %v2434_v4  ;;  %v2439_v12 = vld [vmem:[%s3441_s5 + $0x68] sm:$0xff] }
0x11a3   :  { %v2813_v13 = vpack.c.bf16 %v2439_v12, %v2438_v11 }
0x11a4   :  { %v1845_v15 = vmul.f32 1.442695, %v1842_v14 }
0x11a5   :  { %v1858_v19 = vpop.permute.xlu1 %1857 }
0x11a6   :  { %2873 = vpow2.f32 %v1845_v15  ;;  %2683 = vmatpush3.msra.mxu0 %v1858_v19 }
0x11ac   :  { %v2872_v28 = vpop.eup %2871 }
0x11ad   :  { %v1847_v30 = vsel %vm398_vm6, %v2872_v28, 0.0 }
0x11ae   :  { %1848 = vadd.xlane.f32.xlu0 %v1847_v30 }
0x11b0   :  { %v2874_v29 = vpop.eup %2873 }
0x11b1   :  { %v1850_v31 = vsel %vm398_vm6, %v2874_v29, 0.0 }
0x11b2   :  { %1851 = vadd.xlane.f32.xlu0 %v1850_v31  ;;  %v2425_v31 = vld [vmem:[%s3442_s6 + $0x4] sm:$0xf] }
0x11b3   :  { %v2358_v2 = vrot.slane %v2425_v31, %v1253_v7 }
0x11c8   :  { %1933 = vrot.lane.b32.xlu0 %v3266_v23, %s2970_s16  ;;  %v2422_v23 = vld [vmem:[%s3439_s3 + $0x28] sm:$0xff] }
0x11c9   :  { %v2789_v38 = vpack.c.bf16 %v2422_v23, %v2421_v37 }
0x11cb   :  { %2790 = vmatprep.subr.bf16.mxu0 %v2789_v38 }
0x123b   :  { %v1849_v26 = vpop.xlane.xlu0 %1848 }
0x123c   :  { %2875 = vrcp.f32 %v1849_v26  ;;  %v2136_v26 = vrot.slane %v2425_v31, %v1032_v25  ;;  %v2441_v25 = vld [vmem:[%s3441_s5 + $0x78] sm:$0xff]  ;;  %s2972_s5 = smov [#allocation7]  }
0x123d   :  { %v2817_v40 = vpack.c.bf16 %v2441_v25, %v2440_v39  ;;  %s2368_s1 = sshll.u32 %s2972_s5, 4  ;;  %s2369_s1 = int_to_ptr.vmem [resolvable:$true] %s2368_s1 }
0x123e   :  { %s2931_s3 = scalar_lea.vmem %s2369_s1, 256  ;;  %p2936_p3 = scmp.lt.s32.totalorder %s2369_s1, %s2369_s1 }
0x123f   :  { %v1852_v32 = vpop.xlane.xlu0 %1851  ;;  %p2932_p2 = scmp.ne.s32.totalorder %s2369_s1, %s2931_s3  ;;  %p2937_p4 = scmp.lt.s32.totalorder %s2931_s3, %s2931_s3 }
0x1240   :  { %2877 = vrcp.f32 %v1852_v32 }
0x1241   :  { %p2938_p5 = por %p2937_p4, %p2936_p3 }
0x1243   :  { %v1934_v33 = vpop.permute.xlu0 %1933  ;;  %p2939_p6 = pnand %p2938_p5, %p2932_p2 }
0x1244   :  { %2688 = vmatpush3.msra.mxu1 %v1934_v33 }
0x1246   :  { %v2876_v34 = vpop.eup %2875 }
0x1247   :  { %v1855_v35 = vmul.f32 %v2876_v34, %v2872_v28  ;;  %v2142_v34 = vrot.slane %v2425_v31, %v1038_v27 }
0x1249   :  { %2685 = vmatmul.mubr.msk.f32.vlgmr.msra.gmra.mrb[16].mxu0 %vm398_vm6, %v1855_v35 }
0x124a   :  { %v2878_v20 = vpop.eup %2877  ;;  %2792 = vmatpush3.bf16.msra.mxu0 %v2789_v38 }
0x124b   :  { %v1856_v36 = vmul.f32 %v2878_v20, %v2874_v29  ;;  %2794 = vmatprep.subr.bf16.mxu0 %v2793_v41 }
0x124d   :  { %2690 = vmatmul.mubr.msk.f32.vlgmr.msra.gmra.mrb[24].mxu1 %vm398_vm6, %v1856_v36 }
0x124e   :  { %2796 = vmatpush3.bf16.msra.mxu0 %v2793_v41 }
0x124f   :  { %2806 = vmatprep.subr.bf16.mxu0 %v2805_v9 }
0x131c   :  { %v1929_v42 = vpop.f32.mrb[16].mxu0 }
0x131d   :  { %2011 = vrot.lane.b32.xlu1 %v1929_v42, %s2971_s0  ;;  %v2686_v43 = vpop.f32.mrb[17].mxu0 }
0x1320   :  { %v2005_v44 = vpop.f32.mrb[24].mxu1 }
0x1321   :  { %2013 = vrot.lane.b32.xlu1 %v2005_v44, %s2971_s0  ;;  %v2691_v45 = vpop.f32.mrb[25].mxu1 }
0x138f   :  { %v2012_v46 = vpop.permute.xlu1 %2011 }
0x1390   :  { %v2017_v47 = vsel %vm242_vm2, %v3322_v61, %v2012_v46 }
0x1391   :  { %2700 = vmatprep.mubr.msk.f32.mxu0 %vm61_vm0, %v2017_v47 }
0x1393   :  { %v2014_v48 = vpop.permute.xlu1 %2013 }
0x1394   :  { %v2018_v49 = vsel %vm242_vm2, %v3324_v17, %v2014_v48 }
0x1395   :  { %2701 = vmatmul.mubr.msk.f32.vlgmr.msra.gmra.mrb[18].mxu0 %vm61_vm0, %v2018_v49 }
0x1396   :  { %2808 = vmatpush3.bf16.msra.mxu0 %v2805_v9 }
0x1397   :  { %2810 = vmatprep.subr.bf16.mxu0 %v2809_v10 }
0x139a   :  { %2812 = vmatpush3.bf16.msra.mxu0 %v2809_v10 }
0x139b   :  { %2814 = vmatprep.subr.bf16.mxu0 %v2813_v13 }
0x139e   :  { %2816 = vmatpush3.bf16.msra.mxu0 %v2813_v13 }
0x139f   :  { %2818 = vmatprep.subr.bf16.mxu0 %v2817_v40 }
0x13a2   :  { %2820 = vmatpush3.bf16.msra.mxu0 %v2817_v40 }
0x1468   :  { %v2702_v50 = vpop.f32.mrb[18].mxu0 }
0x1469   :  { %v2104_v51 = vadd.f32 %v2702_v50, %v3258_v22  ;;  %v2098_v52 = vpop.f32.mrb[19].mxu0 }
0x146a   :  { %v2099_v53 = vadd.f32 %v2098_v52, %v3256_v21  ;;  %v2428_v21 = vld [vmem:[%s3440_s4 + $0x20] sm:$0xff] }
0x146b   :  { %v2110_v54 = vsel %vm61_vm0, %v2104_v51, 0.0  ;;  %v2797_v0 = vpack.c.bf16 %v2429_v63, %v2428_v21  ;;  %v2352_v21 = vrot.slane %v2425_v31, %v1247_v6 }
0x146c   :  { %2111 = vadd.xlane.f32.xlu1 %v2110_v54  ;;  %v2107_v55 = vsel %vm61_vm0, %v2099_v53, 0.0 }
0x146d   :  { %2108 = vadd.xlane.f32.xlu0 %v2107_v55  ;;  %2798 = vmatprep.subr.bf16.mxu1 %v2797_v0 }
0x146e   :  { %2800 = vmatpush3.bf16.msra.mxu1 %v2797_v0 }
0x146f   :  { %2802 = vmatprep.subr.bf16.mxu1 %v2801_v3 }
0x1472   :  { %2804 = vmatpush3.bf16.msra.mxu1 %v2801_v3 }
0x14f9   :  { %v2112_v56 = vpop.xlane.xlu1 %2111 }
0x14fa   :  { %v2114_v57 = vmul.f32 0.03125, %v2112_v56  ;;  %v2109_v58 = vpop.xlane.xlu0 %2108 }
0x14fb   :  { %v2113_v59 = vmul.f32 0.03125, %v2109_v58 }
0x14fc   :  { %v2116_v60 = vsub.f32 %v2104_v51, %v2114_v57 }
0x14fd   :  { %v2115_v61 = vsub.f32 %v2099_v53, %v2113_v59 }
0x14fe   :  { %v2118_v16 = vmul.f32 %v2116_v60, %v2116_v60 }
0x14ff   :  { %v2117_v62 = vmul.f32 %v2115_v61, %v2115_v61 }
0x1500   :  { %v2122_v22 = vsel %vm61_vm0, %v2118_v16, 0.0 }
0x1501   :  { %v2119_v17 = vsel %vm61_vm0, %v2117_v62, 0.0 }
0x1502   :  { %2120 = vadd.xlane.f32.xlu0 %v2119_v17 }
0x1506   :  { %2123 = vadd.xlane.f32.xlu0 %v2122_v22 }
0x158f   :  { %v2121_v14 = vpop.xlane.xlu0 %2120 }
0x1590   :  { %v2125_v15 = vmul.f32 0.03125, %v2121_v14 }
0x1592   :  { %v2127_v19 = vadd.f32 1e-05, %v2125_v15 }
0x1593   :  { %v2124_v28 = vpop.xlane.xlu0 %2123 }
0x1594   :  { %2879 = vrsqrt.f32 %v2127_v19  ;;  %v2126_v30 = vmul.f32 0.03125, %v2124_v28 }
0x1596   :  { %v2128_v29 = vadd.f32 1e-05, %v2126_v30 }
0x1598   :  { %2881 = vrsqrt.f32 %v2128_v29 }
0x159e   :  { %v2880_v32 = vpop.eup %2879 }
0x159f   :  { %v2131_v33 = vmul.f32 %v2880_v32, %v2115_v61 }
0x15a1   :  { %v2137_v35 = vmul.f32 %v2136_v26, %v2131_v33 }
0x15a2   :  { %v2882_v20 = vpop.eup %2881 }
0x15a3   :  { %v2132_v36 = vmul.f32 %v2882_v20, %v2116_v60  ;;  %v2143_v37 = vadd.f32 %v2142_v34, %v2137_v35 }
0x15a5   :  { %v2138_v23 = vmul.f32 %v2136_v26, %v2132_v36  ;;  %2711 = vmatprep.mubr.msk.f32.mxu1 %vm61_vm0, %v2143_v37 }
0x15a7   :  { %v2144_v38 = vadd.f32 %v2142_v34, %v2138_v23 }
0x15a9   :  { %2712 = vmatmul.mubr.msk.f32.vlgmr.msra.gmra.mrb[26].mxu1 %vm61_vm0, %v2144_v38 }
0x167c   :  { %v2713_v27 = vpop.f32.mrb[26].mxu1 }
0x167d   :  { %v2222_v41 = vpop.f32.mrb[27].mxu1  ;;  %v2232_v43 = vmax.f32 %v2713_v27, 0.0 }
0x167e   :  { %v2231_v42 = vmax.f32 %v2222_v41, 0.0 }
0x1680   :  { %2730 = vmatprep.mubr.msk.f32.mxu0 %vm1137_vm7, %v2231_v42 }
0x1681   :  { %2731 = vmatmul.mubr.msk.f32.vlgmr.msra.gmra.mrb[20].mxu0 %vm1137_vm7, %v2232_v43 }
0x1754   :  { %v2732_v44 = vpop.f32.mrb[20].mxu0 }
0x1755   :  { %v2320_v45 = vadd.f32 %v2732_v44, %v2144_v38  ;;  %v2314_v46 = vpop.f32.mrb[21].mxu0 }
0x1756   :  { %v2315_v47 = vadd.f32 %v2314_v46, %v2143_v37 }
0x1757   :  { %v2326_v48 = vsel %vm61_vm0, %v2320_v45, 0.0 }
0x1758   :  { %2327 = vadd.xlane.f32.xlu0 %v2326_v48  ;;  %v2323_v49 = vsel %vm61_vm0, %v2315_v47, 0.0 }
0x1759   :  { %2324 = vadd.xlane.f32.xlu1 %v2323_v49 }
0x17e5   :  { %v2328_v50 = vpop.xlane.xlu0 %2327 }
0x17e6   :  { %v2330_v51 = vmul.f32 0.03125, %v2328_v50  ;;  %v2325_v52 = vpop.xlane.xlu1 %2324 }
0x17e7   :  { %v2329_v53 = vmul.f32 0.03125, %v2325_v52 }
0x17e8   :  { %v2332_v54 = vsub.f32 %v2320_v45, %v2330_v51 }
0x17e9   :  { %v2331_v55 = vsub.f32 %v2315_v47, %v2329_v53 }
0x17ea   :  { %v2334_v56 = vmul.f32 %v2332_v54, %v2332_v54 }
0x17eb   :  { %v2333_v57 = vmul.f32 %v2331_v55, %v2331_v55 }
0x17ec   :  { %v2338_v58 = vsel %vm61_vm0, %v2334_v56, 0.0 }
0x17ed   :  { %2339 = vadd.xlane.f32.xlu0 %v2338_v58  ;;  %v2335_v59 = vsel %vm61_vm0, %v2333_v57, 0.0 }
0x17ee   :  { %2336 = vadd.xlane.f32.xlu1 %v2335_v59 }
0x187a   :  { %v2340_v60 = vpop.xlane.xlu0 %2339 }
0x187b   :  { %v2342_v61 = vmul.f32 0.03125, %v2340_v60  ;;  %v2337_v62 = vpop.xlane.xlu1 %2336 }
0x187c   :  { %v2341_v17 = vmul.f32 0.03125, %v2337_v62 }
0x187d   :  { %v2344_v16 = vadd.f32 1e-05, %v2342_v61 }
0x187e   :  { %v2343_v22 = vadd.f32 1e-05, %v2341_v17 }
0x187f   :  { %2883 = vrsqrt.f32 %v2344_v16 }
0x1880   :  { %2885 = vrsqrt.f32 %v2343_v22 }
0x1889   :  { %v2884_v63 = vpop.eup %2883 }
0x188a   :  { %v2886_v0 = vpop.eup %2885  ;;  %v2348_v1 = vmul.f32 %v2884_v63, %v2332_v54 }
0x188b   :  { %v2347_v3 = vmul.f32 %v2886_v0, %v2331_v55 }
0x188c   :  { %v2354_v4 = vmul.f32 %v2352_v21, %v2348_v1 }
0x188d   :  { %v2353_v5 = vmul.f32 %v2352_v21, %v2347_v3 }
0x188e   :  { %v2360_v8 = vadd.f32 %v2358_v2, %v2354_v4 }
0x188f   :  { %v2359_v9 = vadd.f32 %v2358_v2, %v2353_v5 }
0x1890   :  { %2362 = vst.msk [vmem:[#allocation7 + $0x8] sm:$0xff] %vm61_vm0, %v2360_v8 }
0x1891   :  { %2361 = vst.msk [vmem:[#allocation7] sm:$0xff] %vm61_vm0, %v2359_v9 }
0x1892   :  { %2942 = shalt.err (!%p2939_p6)
}
0x1893   :  { %s2943_s27 = scalar_lea.hbm %s3443_s7, 256 }
0x1894   :  { %p2944_p7 = scmp.ne.s32.totalorder %s3443_s7, %s2943_s27  ;;  %p2947_p8 = scmp.lt.u32.totalorder %s2943_s27, %s3443_s7 }
0x1896   :  { %p2949_p9 = pnand %p2947_p8, %p2944_p7 }
0x1898   :  { %2952 = shalt.err (!%p2949_p9)
}
0x1899   :  { %2374 = dma.vmem_to_hbm [thread:$0]  %s2369_s1, 256, %s3443_s7, [#allocation4], %s2960_s11, %s2960_s11, %s2961_s12  }
0x189a   :  { %2957 = dma.done.wait [#allocation4], 256  }
0x189b   :  { %2958 = vsyncadd [#allocation4], 4294967040 }
0x189c   :  { %2378 = vsyncpa [#allocation3], 1 }
0x189d   :  { %2379 = vsyncpa [#allocation6], 1 }
0x189e   :  { %2380 = vsyncpa [#allocation4], 1 }

</bundles_post_ra>
